<compile_context>
chip_gen: v7x
topology: tpu7x:2x2x1
jax: 0.10.0
libtpu: 0.0.40
codegen_flags: <defaults>
</compile_context>

<pallas_src>
import math
import functools

import numpy as np
import jax
import jax.numpy as jnp
from jax.experimental import pallas as pl
from jax.experimental.pallas import tpu as pltpu


def gcnii_kernel(bids_ref, cnts_ref, roffs_ref,            # scalar prefetch (SMEM)
                 a_ref, x_ref, x0_ref, *rest,              # VMEM tiles (+ scratch)
                 alpha, beta, residual):
    """One (row-tile i, compacted adjacency block slot k) grid step.

    a_ref:    (tm, tk) bf16 nonzero adjacency block
    x_ref:    (tk, C)  bf16 gathered feature block (column block bids[i, k])
    x0_ref:   (tm, C)  f32  init_x row tile
    xres_ref: (tm, C)  f32  x row tile (only when residual=True)
    w_ref:    (C,  C)  bf16 dense weight
    o_ref:    (tm, C)       output row tile
    acc_ref:  (tm, C)  f32  spmm accumulator (VMEM scratch)
    """
    if residual:
        xres_ref, w_ref, o_ref, acc_ref = rest
    else:
        w_ref, o_ref, acc_ref = rest

    i = pl.program_id(0)          # node-row tile
    k = pl.program_id(1)          # compacted adjacency block-column slot
    nk = pl.num_programs(1)

    @pl.when(k == 0)
    def _init():
        acc_ref[...] = jnp.zeros_like(acc_ref)

    # Padded (all-zero) adjacency slots: index_map clamps to the previous
    # block (DMA skipped) and this guard skips the MXU work.
    @pl.when(k < cnts_ref[i])
    def _accumulate():
        acc_ref[...] += jnp.dot(a_ref[...], x_ref[...],
                                preferred_element_type=jnp.float32)

    @pl.when(k == nk - 1)
    def _epilogue():
        hidden = (1.0 - alpha) * acc_ref[...] + alpha * x0_ref[...]
        # bf16 epilogue matmul (f32 MXU accumulation); mixes stay f32.
        out = beta * jnp.dot(hidden.astype(w_ref.dtype), w_ref[...],
                             preferred_element_type=jnp.float32) \
              + (1.0 - beta) * hidden
        if residual:
            out = out + xres_ref[...]
        o_ref[...] = out.astype(o_ref.dtype)


def _block_sparse_adjacency(edge_index, edge_attr, n_nodes, tm, tk, dtype):
    """Host-side, one-time graph preprocessing (like building CSR): compact the
    sparse adjacency into a flat ragged array of (tm, tk) blocks that contain
    >= 1 edge, plus per-row-tile block-column ids / counts / offsets."""
    row = np.asarray(edge_index[0], dtype=np.int64)
    col = np.asarray(edge_index[1], dtype=np.int64)
    val = np.asarray(edge_attr, dtype=np.float32)
    num_rt, num_kb = n_nodes // tm, n_nodes // tk
    rt, kb = row // tm, col // tk

    present = np.zeros((num_rt, num_kb), dtype=bool)
    present[rt, kb] = True
    counts = present.sum(axis=1).astype(np.int32)        # nnz blocks per row tile
    row_offsets = np.zeros(num_rt, dtype=np.int32)
    row_offsets[1:] = np.cumsum(counts)[:-1]
    total_blocks = int(counts.sum())
    max_blocks = max(int(counts.max()), 1)

    block_ids = np.zeros((num_rt, max_blocks), dtype=np.int32)
    slot_of = np.zeros((num_rt, num_kb), dtype=np.int64)   # local slot in row tile
    for i in range(num_rt):
        ks = np.flatnonzero(present[i])
        if ks.size:
            block_ids[i, :ks.size] = ks
            block_ids[i, ks.size:] = ks[-1]   # pad: repeat last valid block id
            slot_of[i, ks] = np.arange(ks.size)

    n_alloc = max(total_blocks, 1)
    a_blocks = np.zeros((n_alloc, tm, tk), dtype=np.float32)
    if row.size:
        flat_blk = row_offsets[rt] + slot_of[rt, kb]
        # Duplicate edges accumulate, matching scatter-add spmm semantics.
        np.add.at(a_blocks, (flat_blk, row % tm, col % tk), val)

    return (jnp.asarray(a_blocks, dtype=dtype),
            jnp.asarray(block_ids.reshape(-1)),            # flat 1-D for SMEM
            jnp.asarray(counts),
            jnp.asarray(row_offsets),
            max_blocks, n_alloc)


def gcnii_layer(x, edge_index, edge_attr, init_x, weight, *,
                alpha=0.1, beta=1.0, residual=False, tm=512, tk=256):
    # TODO(synk): a per-edge CSR gather spmm inside the kernel is not
    # implemented; the adjacency is block-compressed (BSR-like) host-side once
    # and only nonzero blocks are streamed through the MXU.
    N, C = x.shape
    tm = min(tm, N)
    tk = min(tk, N)
    assert N % tm == 0 and N % tk == 0
    assert C % 128 == 0, "channel dim must be lane-aligned (pad to 128)"

    (a_blocks, block_ids, counts, row_offsets,
     max_blocks, total_blocks) = _block_sparse_adjacency(
        edge_index, edge_attr, N, tm, tk, jnp.bfloat16)
    num_rt = N // tm

    x_bf16 = x.astype(jnp.bfloat16)      # spmm operands in bf16, f32 accumulate
    w_bf16 = weight.astype(jnp.bfloat16)

    kernel = functools.partial(
        gcnii_kernel, alpha=float(alpha), beta=float(beta),
        residual=bool(residual))

    # scalar-prefetch refs (block_ids, counts, row_offsets) arrive positionally
    # in every index_map.
    def a_map(i, k, bids, cnts, roffs):
        # Clamp padded slots to the last valid block of this row tile so the
        # block index is unchanged between consecutive steps -> DMA skipped.
        kk = jnp.maximum(jnp.minimum(k, cnts[i] - 1), 0)
        return (jnp.minimum(roffs[i] + kk, total_blocks - 1), 0, 0)

    def x_map(i, k, bids, cnts, roffs):
        return (bids[i * max_blocks + k], 0)   # padded ids repeat last valid

    def row_map(i, k, bids, cnts, roffs):
        return (i, 0)

    def w_map(i, k, bids, cnts, roffs):
        return (0, 0)

    in_specs = [
        pl.BlockSpec((None, tm, tk), a_map),   # nonzero A block (flat ragged)
        pl.BlockSpec((tk, C), x_map),          # gathered X block
        pl.BlockSpec((tm, C), row_map),        # init_x row tile
    ]
    inputs = [block_ids, counts, row_offsets, a_blocks, x_bf16, init_x]
    if residual:
        in_specs.append(pl.BlockSpec((tm, C), row_map))   # x row tile
        inputs.append(x)
    in_specs.append(pl.BlockSpec((C, C), w_map))           # weight (bf16)
    inputs.append(w_bf16)

    flops = 2 * total_blocks * tm * tk * C + 2 * N * C * C
    bytes_accessed = (total_blocks * tm * tk * 2          # A blocks (bf16)
                      + total_blocks * tk * C * 2         # gathered X (bf16)
                      + N * C * 4 * (3 if residual else 2)  # init_x (+x), out
                      + C * C * 2)                        # weight
    cost = pl.CostEstimate(flops=int(flops), transcendentals=0,
                           bytes_accessed=int(bytes_accessed))

    return pl.pallas_call(
        kernel,
        out_shape=jax.ShapeDtypeStruct((N, C), x.dtype),
        grid_spec=pltpu.PrefetchScalarGridSpec(
            num_scalar_prefetch=3,
            grid=(num_rt, max_blocks),
            in_specs=in_specs,
            out_specs=pl.BlockSpec((tm, C), row_map),
            scratch_shapes=[pltpu.VMEM((tm, C), jnp.float32)],
        ),
        compiler_params=pltpu.CompilerParams(
            dimension_semantics=("parallel", "arbitrary"),
            vmem_limit_bytes=48 * 1024 * 1024),
        cost_estimate=cost,
    )(*inputs)


if __name__ == "__main__":
    N, C, E = 512, 128, 2048            # nodes, channels, edges
    alpha, beta, residual = 0.1, 0.5, True
    tm, tk = 256, 128                   # 2 row tiles (exercises parallel axis),
                                        # 4 column blocks (exercises skip/clamp)

    key = jax.random.PRNGKey(0)
    k1, k2, k3, k4, k5, k6, k7 = jax.random.split(key, 7)

    x = jax.random.normal(k1, (N, C), jnp.float32)
    init_x = jax.random.normal(k2, (N, C), jnp.float32)

    # Block-structured sparse graph: rows in the lower half only connect to
    # upper-half columns, so some (tm, tk) adjacency blocks are empty and the
    # padded-slot skip / clamped-DMA path is exercised.
    row = jax.random.randint(k3, (E,), 0, N)
    col_any = jax.random.randint(k4, (E,), 0, N)
    col_hi = jax.random.randint(k5, (E,), N // 2, N)
    col = jnp.where(row < N // 2, col_any, col_hi)
    edge_index = jnp.stack([row, col])
    edge_attr = jax.random.uniform(k6, (E,), jnp.float32, 0.0, 1.0)

    # deterministic parameter init matching reset_parameters():
    stdv = 1.0 / math.sqrt(C)
    weight = jax.random.uniform(k7, (C, C), jnp.float32, -stdv, stdv)

    out = gcnii_layer(x, edge_index, edge_attr, init_x, weight,
                      alpha=alpha, beta=beta, residual=residual,
                      tm=tm, tk=tk)
    out = jax.block_until_ready(out)

    # plain-JAX reference using the same bf16-operand / f32-accumulate math,
    # with the same column-block accumulation order as the kernel.
    a_dense = jnp.zeros((N, N), jnp.float32).at[row, col].add(edge_attr)
    hidden = jnp.zeros((N, C), jnp.float32)
    for kb in range(N // tk):
        a_blk = a_dense[:, kb * tk:(kb + 1) * tk].astype(jnp.bfloat16)
        x_blk = x[kb * tk:(kb + 1) * tk].astype(jnp.bfloat16)
        hidden = hidden + jnp.dot(a_blk, x_blk,
                                  preferred_element_type=jnp.float32)
    hidden = (1.0 - alpha) * hidden + alpha * init_x
    ref = beta * jnp.dot(hidden.astype(jnp.bfloat16),
                         weight.astype(jnp.bfloat16),
                         preferred_element_type=jnp.float32) \
          + (1.0 - beta) * hidden
    if residual:
        ref = ref + x

    assert out.shape == (N, C) and out.dtype == jnp.float32
    err = float(jnp.max(jnp.abs(out - ref)))
    assert jnp.allclose(out, ref, atol=5e-3, rtol=5e-3), err
    print("KERNEL_OK")
</pallas_src>

<mosaic_0001>
module attributes {stable_mosaic.version = 11 : i64} {
  func.func @gcnii_kernel(%arg0: i32, %arg1: i32, %arg2: memref<8xi32, #tpu.memory_space<smem>>, %arg3: memref<2xi32, #tpu.memory_space<smem>>, %arg4: memref<2xi32, #tpu.memory_space<smem>>, %arg5: memref<1x256x128xbf16, #tpu.memory_space<vmem>>, %arg6: memref<128x128xbf16, #tpu.memory_space<vmem>>, %arg7: memref<256x128xf32, #tpu.memory_space<vmem>>, %arg8: memref<256x128xf32, #tpu.memory_space<vmem>>, %arg9: memref<128x128xbf16, #tpu.memory_space<vmem>>, %arg10: memref<256x128xf32, #tpu.memory_space<vmem>>, %arg11: memref<256x128xf32, #tpu.memory_space<vmem>>) attributes {dimension_semantics = [#tpu.dimension_semantics<parallel>, #tpu.dimension_semantics<arbitrary>], iteration_bounds = array<i64: 2, 4>, scalar_prefetch = 3 : i64, scratch_operands = 1 : i64, tpu.core_type = #tpu.core_type<tc>, window_params = [{transform_indices = @transform_0, window_bounds = array<i64: 1, 256, 128>}, {transform_indices = @transform_1, window_bounds = array<i64: 128, 128>}, {transform_indices = @transform_2, window_bounds = array<i64: 256, 128>}, {transform_indices = @transform_3, window_bounds = array<i64: 256, 128>}, {pipeline_mode = #tpu.pipeline_mode<synchronous>, transform_indices = @transform_4, window_bounds = array<i64: 128, 128>}, {transform_indices = @transform_5, window_bounds = array<i64: 256, 128>}]} {
    %c0_i32 = arith.constant 0 : i32
    %0 = arith.cmpi eq, %arg1, %c0_i32 : i32
    %1 = arith.extui %0 : i1 to i32
    %c0_i32_0 = arith.constant 0 : i32
    %2 = arith.cmpi ne, %1, %c0_i32_0 : i32
    scf.if %2 {
      %cst = arith.constant 0.000000e+00 : f32
      %11 = vector.broadcast %cst : f32 to vector<256x128xf32>
      %c0 = arith.constant 0 : index
      %c0_3 = arith.constant 0 : index
      %12 = vector.load %arg11[%c0, %c0_3] : memref<256x128xf32, #tpu.memory_space<vmem>>, vector<256x128xf32>
      tpu.vector_store %arg11[%c0, %c0_3], %11 {strides = array<i32>} : memref<256x128xf32, #tpu.memory_space<vmem>>, vector<256x128xf32>,
    } else {
    }
    %3 = arith.index_cast %arg0 : i32 to index
    %4 = memref.load %arg3[%3] : memref<2xi32, #tpu.memory_space<smem>>
    %5 = arith.cmpi slt, %arg1, %4 : i32
    %6 = arith.extui %5 : i1 to i32
    %c0_i32_1 = arith.constant 0 : i32
    %7 = arith.cmpi ne, %6, %c0_i32_1 : i32
    scf.if %7 {
      %c0 = arith.constant 0 : index
      %c0_3 = arith.constant 0 : index
      %11 = vector.load %arg11[%c0, %c0_3] : memref<256x128xf32, #tpu.memory_space<vmem>>, vector<256x128xf32>
      %c0_4 = arith.constant 0 : index
      %c0_5 = arith.constant 0 : index
      %c0_6 = arith.constant 0 : index
      %12 = vector.load %arg5[%c0_4, %c0_5, %c0_6] : memref<1x256x128xbf16, #tpu.memory_space<vmem>>, vector<1x256x128xbf16>
      %13 = vector.shape_cast %12 : vector<1x256x128xbf16> to vector<256x128xbf16>
      %c0_7 = arith.constant 0 : index
      %c0_8 = arith.constant 0 : index
      %14 = vector.load %arg6[%c0_7, %c0_8] : memref<128x128xbf16, #tpu.memory_space<vmem>>, vector<128x128xbf16>
      %cst = arith.constant dense<0.000000e+00> : vector<256x128xf32>
      %15 = tpu.matmul %13, %14, %cst {dimension_numbers = #tpu.dot_dimension_numbers<[1], [0], [0], [1], [0, 0, 1, 1], [], []>} : vector<256x128xbf16>, vector<128x128xbf16>, vector<256x128xf32> -> vector<256x128xf32>
      %16 = arith.addf %11, %15 : vector<256x128xf32>
      %c0_9 = arith.constant 0 : index
      %c0_10 = arith.constant 0 : index
      %17 = vector.load %arg11[%c0_9, %c0_10] : memref<256x128xf32, #tpu.memory_space<vmem>>, vector<256x128xf32>
      tpu.vector_store %arg11[%c0_9, %c0_10], %16 {strides = array<i32>} : memref<256x128xf32, #tpu.memory_space<vmem>>, vector<256x128xf32>,
    } else {
    }
    %c3_i32 = arith.constant 3 : i32
    %8 = arith.cmpi eq, %arg1, %c3_i32 : i32
    %9 = arith.extui %8 : i1 to i32
    %c0_i32_2 = arith.constant 0 : i32
    %10 = arith.cmpi ne, %9, %c0_i32_2 : i32
    scf.if %10 {
      %c0 = arith.constant 0 : index
      %c0_3 = arith.constant 0 : index
      %11 = vector.load %arg11[%c0, %c0_3] : memref<256x128xf32, #tpu.memory_space<vmem>>, vector<256x128xf32>
      %cst = arith.constant 0.899999976 : f32
      %12 = vector.broadcast %cst : f32 to vector<256x128xf32>
      %13 = arith.mulf %12, %11 : vector<256x128xf32>
      %c0_4 = arith.constant 0 : index
      %c0_5 = arith.constant 0 : index
      %14 = vector.load %arg7[%c0_4, %c0_5] : memref<256x128xf32, #tpu.memory_space<vmem>>, vector<256x128xf32>
      %cst_6 = arith.constant 1.000000e-01 : f32
      %15 = vector.broadcast %cst_6 : f32 to vector<256x128xf32>
      %16 = arith.mulf %15, %14 : vector<256x128xf32>
      %17 = arith.addf %13, %16 : vector<256x128xf32>
      %18 = arith.truncf %17 : vector<256x128xf32> to vector<256x128xbf16>
      %c0_7 = arith.constant 0 : index
      %c0_8 = arith.constant 0 : index
      %19 = vector.load %arg9[%c0_7, %c0_8] : memref<128x128xbf16, #tpu.memory_space<vmem>>, vector<128x128xbf16>
      %cst_9 = arith.constant dense<0.000000e+00> : vector<256x128xf32>
      %20 = tpu.matmul %18, %19, %cst_9 {dimension_numbers = #tpu.dot_dimension_numbers<[1], [0], [0], [1], [0, 0, 1, 1], [], []>} : vector<256x128xbf16>, vector<128x128xbf16>, vector<256x128xf32> -> vector<256x128xf32>
      %cst_10 = arith.constant 5.000000e-01 : f32
      %21 = vector.broadcast %cst_10 : f32 to vector<256x128xf32>
      %22 = arith.mulf %21, %20 : vector<256x128xf32>
      %cst_11 = arith.constant 5.000000e-01 : f32
      %23 = vector.broadcast %cst_11 : f32 to vector<256x128xf32>
      %24 = arith.mulf %23, %17 : vector<256x128xf32>
      %25 = arith.addf %22, %24 : vector<256x128xf32>
      %c0_12 = arith.constant 0 : index
      %c0_13 = arith.constant 0 : index
      %26 = vector.load %arg8[%c0_12, %c0_13] : memref<256x128xf32, #tpu.memory_space<vmem>>, vector<256x128xf32>
      %27 = arith.addf %25, %26 : vector<256x128xf32>
      %c0_14 = arith.constant 0 : index
      %c0_15 = arith.constant 0 : index
      %28 = vector.load %arg10[%c0_14, %c0_15] : memref<256x128xf32, #tpu.memory_space<vmem>>, vector<256x128xf32>
      tpu.vector_store %arg10[%c0_14, %c0_15], %27 {strides = array<i32>} : memref<256x128xf32, #tpu.memory_space<vmem>>, vector<256x128xf32>,
    } else {
    }
    return
  }
  func.func @transform_0(%arg0: i32, %arg1: i32, %arg2: memref<8xi32, #tpu.memory_space<smem>>, %arg3: memref<2xi32, #tpu.memory_space<smem>>, %arg4: memref<2xi32, #tpu.memory_space<smem>>) -> (i32, i32, i32) {
    %0 = arith.index_cast %arg0 : i32 to index
    %1 = memref.load %arg3[%0] : memref<2xi32, #tpu.memory_space<smem>>
    %c1_i32 = arith.constant 1 : i32
    %2 = arith.subi %1, %c1_i32 : i32
    %3 = arith.minsi %arg1, %2 : i32
    %c0_i32 = arith.constant 0 : i32
    %4 = arith.maxsi %3, %c0_i32 : i32
    %5 = arith.index_cast %arg0 : i32 to index
    %6 = memref.load %arg4[%5] : memref<2xi32, #tpu.memory_space<smem>>
    %7 = arith.addi %6, %4 : i32
    %c5_i32 = arith.constant 5 : i32
    %8 = arith.minsi %7, %c5_i32 : i32
    %c0_i32_0 = arith.constant 0 : i32
    %c0_i32_1 = arith.constant 0 : i32
    %c0_i32_2 = arith.constant 0 : i32
    return %8, %c0_i32_0, %c0_i32_1 : i32, i32, i32
  }
  func.func @transform_1(%arg0: i32, %arg1: i32, %arg2: memref<8xi32, #tpu.memory_space<smem>>, %arg3: memref<2xi32, #tpu.memory_space<smem>>, %arg4: memref<2xi32, #tpu.memory_space<smem>>) -> (i32, i32) {
    %c4_i32 = arith.constant 4 : i32
    %0 = arith.muli %arg0, %c4_i32 : i32
    %1 = arith.addi %0, %arg1 : i32
    %2 = arith.index_cast %1 : i32 to index
    %3 = memref.load %arg2[%2] : memref<8xi32, #tpu.memory_space<smem>>
    %c0_i32 = arith.constant 0 : i32
    %c0_i32_0 = arith.constant 0 : i32
    return %3, %c0_i32 : i32, i32
  }
  func.func @transform_2(%arg0: i32, %arg1: i32, %arg2: memref<8xi32, #tpu.memory_space<smem>>, %arg3: memref<2xi32, #tpu.memory_space<smem>>, %arg4: memref<2xi32, #tpu.memory_space<smem>>) -> (i32, i32) {
    %c0_i32 = arith.constant 0 : i32
    %c0_i32_0 = arith.constant 0 : i32
    return %arg0, %c0_i32 : i32, i32
  }
  func.func @transform_3(%arg0: i32, %arg1: i32, %arg2: memref<8xi32, #tpu.memory_space<smem>>, %arg3: memref<2xi32, #tpu.memory_space<smem>>, %arg4: memref<2xi32, #tpu.memory_space<smem>>) -> (i32, i32) {
    %c0_i32 = arith.constant 0 : i32
    %c0_i32_0 = arith.constant 0 : i32
    return %arg0, %c0_i32 : i32, i32
  }
  func.func @transform_4(%arg0: i32, %arg1: i32, %arg2: memref<8xi32, #tpu.memory_space<smem>>, %arg3: memref<2xi32, #tpu.memory_space<smem>>, %arg4: memref<2xi32, #tpu.memory_space<smem>>) -> (i32, i32) {
    %c0_i32 = arith.constant 0 : i32
    %c0_i32_0 = arith.constant 0 : i32
    %c0_i32_1 = arith.constant 0 : i32
    return %c0_i32, %c0_i32_0 : i32, i32
  }
  func.func @transform_5(%arg0: i32, %arg1: i32, %arg2: memref<8xi32, #tpu.memory_space<smem>>, %arg3: memref<2xi32, #tpu.memory_space<smem>>, %arg4: memref<2xi32, #tpu.memory_space<smem>>) -> (i32, i32) {
    %c0_i32 = arith.constant 0 : i32
    %c0_i32_0 = arith.constant 0 : i32
    return %arg0, %c0_i32 : i32, i32
  }
}

</mosaic_0001>

<bundles_post_ra>
// kernel: tpu_custom_call.1
= control target key start
LH: loop header
LB: loop body
LE: loop exit
PB: predicated region body
PF: predicated region fallthrough
CT: control target
= control target key end

     0   :  { %s3414_s0 = inlined_call_operand.hbm [shape: s32[8], index: 0, kind: input, shape index: {}]   ;;  %s3415_s3 = inlined_call_operand.hbm [shape: bf16[6,256,128], index: 3, kind: input, shape index: {}]   ;;  %s3416_s4 = inlined_call_operand.hbm [shape: bf16[512,128], index: 4, kind: input, shape index: {}]   ;;  %s3417_s5 = inlined_call_operand.hbm [shape: f32[512,128], index: 5, kind: input, shape index: {}]   ;;  %s3418_s6 = inlined_call_operand.hbm [shape: f32[512,128], index: 6, kind: input, shape index: {}]   ;;  %s3419_s7 = inlined_call_operand.hbm [shape: bf16[128,128], index: 7, kind: input, shape index: {}]   ;;  %s3420_s8 = inlined_call_operand.hbm [shape: f32[512,128], index: 8, kind: output, shape index: {}]   ;;  %s3421_s1 = inlined_call_operand.vmem [shape: s32[2], index: 1, kind: input, shape index: {}]   ;;  %s3422_s2 = inlined_call_operand.vmem [shape: s32[2], index: 2, kind: input, shape index: {}]  }
   0x1   :  { %3451 = sst [smem:[#allocation46_spill]] %s3415_s3  ;;  %s2175_s29 = scalar_lea.hbm %s3414_s0, 16 }
   0x2   :  { %3452 = sst [smem:[#allocation47_spill]] %s3416_s4  ;;  %p2176_p0 = scmp.ne.s32.totalorder %s3414_s0, %s2175_s29 }
   0x3   :  { %3453 = sst [smem:[#allocation48_spill]] %s3418_s6  ;;  %p2179_p1 = scmp.lt.u32.totalorder %s2175_s29, %s3414_s0 }
   0x4   :  { %3454 = sst [smem:[#allocation49_spill]] %s3419_s7 }
   0x5   :  { %3455 = sst [smem:[#allocation50_spill]] %s3420_s8  ;;  %p2181_p2 = pnand %p2179_p1, %p2176_p0 }
   0x7   :  { %2184 = shalt.err (!%p2181_p2)  }
   0x8   :  { %s2523_s12 = smov [#allocation4]   ;;  %s15_s17 = sshll.u32 %s3421_s1, 4  ;;  %s16_s17 = int_to_ptr.vmem [resolvable:$true] %s15_s17 }
   0x9   :  { %14 = dma.hbm_to_smem %s3414_s0, 16, %s2523_s12, [#allocation3] }
   0xa   :  { %s19_s20 = sshll.u32 %s3422_s2, 4  ;;  %s2185_s21 = scalar_lea.vmem %s16_s17, 16  ;;  %s20_s20 = int_to_ptr.vmem [resolvable:$true] %s19_s20 }
   0xb   :  { %p2186_p3 = scmp.ne.s32.totalorder %s16_s17, %s2185_s21  ;;  %p2190_p4 = scmp.lt.s32.totalorder %s16_s17, %s16_s17 }
   0xc   :  { %p2191_p5 = scmp.lt.s32.totalorder %s2185_s21, %s2185_s21 }
   0xe   :  { %p2192_p6 = por %p2191_p5, %p2190_p4 }
  0x10   :  { %p2193_p7 = pnand %p2192_p6, %p2186_p3 }
  0x12   :  { %2196 = shalt.err (!%p2193_p7)  }
  0x13   :  { %s2524_s22 = smov [#allocation5]   ;;  %s2197_s0 = scalar_lea.vmem %s20_s20, 16 }
  0x14   :  { %18 = dma.vmem_to_smem %s16_s17, 16, %s2524_s22, [#allocation3] }
  0x15   :  { %p2198_p8 = scmp.ne.s32.totalorder %s20_s20, %s2197_s0  ;;  %p2202_p9 = scmp.lt.s32.totalorder %s20_s20, %s20_s20 }
  0x16   :  { %p2203_p10 = scmp.lt.s32.totalorder %s2197_s0, %s2197_s0 }
  0x18   :  { %p2204_p11 = por %p2203_p10, %p2202_p9 }
  0x1a   :  { %p2205_p12 = pnand %p2204_p11, %p2198_p8 }
  0x1c   :  { %2208 = shalt.err (!%p2205_p12)  }
  0x1d   :  { %s2525_s1 = smov [#allocation6]  }
  0x1e   :  { %22 = dma.vmem_to_smem %s20_s20, 16, %s2525_s1, [#allocation3] }
  0x1f   :  { %2441 = dma.done.wait [#allocation3], 48 }
  0x20   :  { %2442 = vsyncadd [#allocation3], 4294967248 }
  0x21   :  { %24 = sfence }
  0x22   :  { %25 = vsyncpa [#allocation8], 0 }
  0x23   :  { %27 = vsyncpa [#allocation8 + $0x1], 0 }
  0x24   :  { %28 = vsyncpa [#allocation11], 0 }
  0x25   :  { %30 = vsyncpa [#allocation11 + $0x1], 0 }
  0x26   :  { %31 = vsyncpa [#allocation14], 0 }
  0x27   :  { %33 = vsyncpa [#allocation14 + $0x1], 0 }
  0x28   :  { %34 = vsyncpa [#allocation9], 0 }
  0x29   :  { %36 = vsyncpa [#allocation9 + $0x1], 0  ;;  %s2602_s2 = smov 0   ;;  %s2604_s23 = smov 0  }
  0x2a   :  { %s2606_s24 = smov 0   ;;  %s2608_s25 = smov 0  }
  0x2b   :  { %s2610_s26 = smov 0   ;;  %s2612_s27 = smov 0  }
  0x2c   :  { %s2614_s28 = smov 0   ;;  %s2616_s29 = smov 0  }
  0x2d   :  { %s2618_s30 = smov 0   ;;  %s2620_s9 = smov 0  }
  0x2e   :  { %s2622_s10 = smov 0   ;;  %s2624_s11 = smov 0  }
  0x2f   :  { %s2626_s12 = smov 0   ;;  %s2628_s13 = smov 0  }
  0x30 LB: > { %3456 = sst [smem:[#allocation30_spill]] %s2469_s2  ;;  %s2673_s14 = sadd.s32 4294967295, %s2521_s13   ;;  %s2521_s13 = sphi %s2628_s13, %s42_s13   ;;  %s2517_s12 = sphi %s2626_s12, %s3549_s12   ;;  %s2513_s11 = sphi %s2624_s11, %s3548_s11   ;;  %s2509_s10 = sphi %s2622_s10, %s3547_s10   ;;  %s2505_s9 = sphi %s2620_s9, %s3539_s9   ;;  %s2501_s30 = sphi %s2618_s30, %s3546_s30   ;;  %s2497_s29 = sphi %s2616_s29, %s3545_s29   ;;  %s2493_s28 = sphi %s2614_s28, %s3544_s28   ;;  %s2489_s27 = sphi %s2612_s27, %s3537_s27   ;;  %s2485_s26 = sphi %s2610_s26, %s3536_s26   ;;  %s2481_s25 = sphi %s2608_s25, %s3535_s25   ;;  %s2477_s24 = sphi %s2606_s24, %s3534_s24   ;;  %s2473_s23 = sphi %s2604_s23, %s3543_s23   ;;  %s2469_s2 = sphi %s2602_s2, %s3542_s2  }
  0x31   : > { %3457 = sst [smem:[#allocation31_spill]] %s2477_s24  ;;  %p1724_p13 = scmp.ge.s32.totalorder %s2521_s13, 1 }
  0x32   : > { %3458 = sst [smem:[#allocation32_spill]] %s2485_s26  ;;  %p3424_p0 = scmp.eq.s32.totalorder %s2673_s14, 0 }
  0x33   : > { %3459 = sst [smem:[#allocation33_spill]] %s2489_s27  ;;  %p236_p2 = scmp.lt.s32.totalorder %s2521_s13, 9 }
  0x34   : > { %3460 = sst [smem:[#allocation34_spill]] %s2505_s9  ;;  %s2526_s16 = smov [#allocation15]  }
  0x35   : > { %3461 = sst [smem:[#allocation35_spill]] %s2509_s10  ;;  %p2679_p3 = pnand %p1724_p13, %p236_p2 }
  0x36   : > { %3462 = sst [smem:[#allocation36_spill]] %s2513_s11  ;;  %s248_s17 = sshll.u32 %s2526_s16, 4  ;;  %s249_s17 = int_to_ptr.vmem [resolvable:$true] %s248_s17 }
  0x37   : > { %s3463_s15 = scalar_select %p2679_p3, 1, 0 }
  0x38   : > { %p1989_p4 = pneg %p2679_p3  ;;  %s3466_s7 = sld [smem:[#allocation49_spill]] }
  0x39   : > { %3464 = sst [smem:[#allocation37_spill]] %s3463_s15 }
  0x3a   : > { %p2688_p6 = pnand %p1989_p4, %p3424_p0 }
  0x3c   : > { %p2211_p8 = pneg %p2688_p6 }
  0x3e   : > { %s2209_s21 = scalar_lea.hbm %s3466_s7, 1024 }
  0x3f   : > { %p2210_p7 = scmp.ne.s32.totalorder %s3466_s7, %s2209_s21  ;;  %p2216_p11 = scmp.lt.u32.totalorder %s2209_s21, %s3466_s7 }
  0x41   : > { %p2212_p9 = pnand %p2211_p8, %p2210_p7 }
  0x43   : > { %p2213_p10 = pneg %p2212_p9 }
  0x45   : > { %p2218_p12 = pnand %p2216_p11, %p2213_p10 }
  0x47   : > { %2221 = shalt.err (!%p2218_p12)
}
  0x48   : > { %s2222_s8 = scalar_lea.vmem %s249_s17, 1024  ;;  %p2230_p1 = scmp.lt.s32.totalorder %s249_s17, %s249_s17 }
  0x49   : > { %p2223_p13 = scmp.ne.s32.totalorder %s249_s17, %s2222_s8  ;;  %p2231_p5 = scmp.lt.s32.totalorder %s2222_s8, %s2222_s8 }
  0x4b   : > { %p2225_p2 = pnand %p2223_p13, %p2211_p8  ;;  %p2232_p0 = por %p2231_p5, %p2230_p1 }
  0x4d   : > { %p2226_p4 = pneg %p2225_p2 }
  0x4f   : > { %p2233_p3 = pnand %p2232_p0, %p2226_p4 }
  0x51   : > { %2236 = shalt.err (!%p2233_p3)
}
  0x52   : > { %s3426_s19 = smov 64   ;;  %s3428_s20 = smov 4  }
  0x53   : > { %1992 = dma.hbm_to_vmem [thread:$0]  (!%p2688_p6), %s3466_s7, 1024, %s249_s17, [#allocation14], %s3426_s19, %s3426_s19, %s3428_s20  }
  0x54   : > { %s51_s22 = sadd.s32 1, %s2513_s11  ;;  %s54_s0 = sadd.s32 1, %s2517_s12 }
  0x55   : > { %p52_p0 = scmp.ge.s32.totalorder %s51_s22, 4  ;;  %p3436_p1 = scmp.eq.s32.totalorder %s2521_s13, 0 }
  0x56   : > { %s1722_s1 = sshll.u32 %s2517_s12, 2  ;;  %s113_s16 = sadd.s32 1, %s2489_s27 }
  0x57   : > { %s3551_s22 = smov (%p52_p0, %s51_s22), 0  ;;  %s3553_s0 = smov (!%p52_p0, %s54_s0), %s2517_s12 }
  0x58   : > { %3467 = sst [smem:[#allocation38_spill]] %s3551_s22  ;;  %s105_s18 = sadd.s32 %s2513_s11, %s1722_s1 }
  0x59   : > { %p56_p3 = scmp.ge.s32.totalorder %s3553_s0, 2  ;;  %s106_s8 = sld [smem:[#allocation4 + %s105_s18]] }
  0x5a   : > { %p120_p5 = scmp.ne.s32.totalorder %s2489_s27, %s2485_s26  ;;  %p126_p6 = scmp.ne.s32.totalorder %s2485_s26, %s2481_s25 }
  0x5b   : > { %s3555_s0 = smov (%p56_p3, %s3553_s0), 0  ;;  %p3470_p8 = scmp.eq.s32.totalorder %s2673_s14, 0 }
  0x5c   : > { %3468 = sst [smem:[#allocation39_spill]] %s3555_s0  ;;  %p2728_p7 = por %p120_p5, %p3436_p1 }
  0x5d   : > { %p2734_p9 = por %p126_p6, %p3470_p8  ;;  %s1723_s1 = sshll.u32 %s3555_s0, 2 }
  0x5e   : > { %s108_s19 = sadd.s32 %s1723_s1, %s3551_s22  ;;  %s295_s7 = sand.u32 1, %s2489_s27  }
  0x5f   : > { %s3471_s21 = scalar_select %p2734_p9, 1, 0 }
  0x60   : > { %s109_s20 = sld [smem:[#allocation4 + %s108_s19]]  ;;  %s1731_s10 = sshll.u32 %s295_s7, 6 }
  0x61   : > { %3472 = sst [smem:[#allocation40_spill]] %s3471_s21  ;;  %p3473_p10 = scmp.lt.s32.totalorder %s2521_s13, 8 }
  0x62   : > { %s1976_s21 = scalar_select %p2728_p7, [#allocation4], [#allocation19] }
  0x63   : > { %p2746_p11 = pnand %p3473_p10, %p2728_p7  ;;  %s3557_s18 = smov (!%p2728_p7, %s105_s18), 0 }
  0x64   : > { %p3475_p12 = pmov %p3473_p10  ;;  %s297_s1 = scalar_lea.vmem [#allocation10], %s1731_s10 }
  0x65   : > { %s307_s7 = sshll.u32 %s297_s1, 4  ;;  %p3476_p2 = pmov %p3473_p10  ;;  %s2756_s7 = int_to_ptr.vmem [resolvable:$true] %s307_s7 }
  0x66   : > { %s3559_s21 = smov (!%p3475_p12, %s1976_s21), [#allocation22]  ;;  %s110_s19 = ssub.s32 %s106_s8, %s109_s20 }
  0x67   : > { %p111_p13 = scmp.eq.s32.totalorder %s110_s19, 0  ;;  %s3561_s18 = smov (!%p3476_p2, %s3557_s18), 0 }
  0x68   : > { %s300_s17 = sld [smem:[%s3559_s21 + %s3561_s18]]  ;;  %s3479_s18 = sand.u32 1, %s2521_s13  }
  0x69   : > { %s2761_s25 = scalar_select %p111_p13, %s2489_s27, %s113_s16  }
  0x6a   : > { %s2764_s26 = sld [smem:[#allocation5 + %s2517_s12]]  ;;  %s2785_s16 = scalar_lea.sflag [#allocation11], %s3479_s18 }
  0x6b   : > { %3477 = sst [smem:[#allocation41_spill]] %s2761_s25  ;;  %s3478_s4 = sld [smem:[#allocation47_spill]] }
  0x6c   : > { %s2767_s15 = sld [smem:[#allocation6 + %s2517_s12]]  ;;  %p2239_p3 = pneg %p2746_p11 }
  0x6d   : > { %s2770_s6 = sld [smem:[#allocation5 + %s3555_s0]] }
  0x6e   : > { %s2773_s20 = sld [smem:[#allocation6 + %s3555_s0]]  ;;  %s1789_s10 = sshll.u32 %s300_s17, 10 }
  0x71   : > { %s2779_s3 = scalar_lea.hbm %s3478_s4, %s1789_s10  ;;  %s2242_s10 = scalar_lea.hbm %s3478_s4, 4096 }
  0x72   : > { %s2237_s21 = scalar_lea.hbm %s2779_s3, 1024  ;;  %p2243_p7 = scmp.lt.u32.totalorder %s2779_s3, %s3478_s4 }
  0x73   : > { %p2238_p0 = scmp.ne.s32.totalorder %s2779_s3, %s2237_s21  ;;  %p2244_p8 = scmp.lt.u32.totalorder %s2242_s10, %s2237_s21 }
  0x74   : > { %p2246_p12 = scmp.lt.u32.totalorder %s2237_s21, %s2779_s3 }
  0x75   : > { %p2240_p5 = pnand %p2239_p3, %p2238_p0  ;;  %p2245_p10 = por %p2244_p8, %p2243_p7 }
  0x77   : > { %p2241_p6 = pneg %p2240_p5  ;;  %p2247_p13 = por %p2246_p12, %p2245_p10 }
  0x79   : > { %p2248_p2 = pnand %p2247_p13, %p2241_p6 }
  0x7b   : > { %2251 = shalt.err (!%p2248_p2)
}
  0x7c   : > { %s2252_s18 = scalar_lea.vmem %s2756_s7, 1024  ;;  %s2529_s17 = smov [#allocation10]  }
  0x7d   : > { %p2253_p0 = scmp.ne.s32.totalorder %s2756_s7, %s2252_s18  ;;  %s2257_s19 = sshll.u32 %s2529_s17, 4  ;;  %s2258_s19 = int_to_ptr.vmem [resolvable:$false] %s2257_s19 }
  0x7e   : > { %s2259_s8 = scalar_lea.vmem %s2258_s19, 2048  ;;  %p2260_p4 = scmp.lt.s32.totalorder %s2756_s7, %s2258_s19 }
  0x7f   : > { %p2255_p5 = pnand %p2253_p0, %p2239_p3  ;;  %p2261_p7 = scmp.lt.s32.totalorder %s2259_s8, %s2252_s18 }
  0x81   : > { %p2256_p1 = pneg %p2255_p5  ;;  %p2262_p8 = por %p2261_p7, %p2260_p4 }
  0x83   : > { %p2263_p10 = pnand %p2262_p8, %p2256_p1 }
  0x85   : > { %2266 = shalt.err (!%p2263_p10)
}
  0x86   : > { %s3480_s21 = smov 4   ;;  %s3481_s10 = smov 64  }
  0x87   : > { %2005 = dma.hbm_to_vmem [thread:$0]  (!%p2746_p11), %s2779_s3, 1024, %s2756_s7, %s2785_s16, %s3481_s10, %s3481_s10, %s3480_s21  }
  0x88   : > { %p3482_p1 = scmp.ne.s32.totalorder %s2501_s30, %s2497_s29  ;;  %p3483_p4 = scmp.eq.s32.totalorder %s2521_s13, 0 }
  0x89   : > { %p94_p6 = scmp.ne.s32.totalorder %s2497_s29, %s2493_s28  ;;  %s1720_s1 = sadd.s32 4294967295, %s2764_s26 }
  0x8a   : > { %p2821_p3 = por %p3483_p4, %p3482_p1  ;;  %s3437_s18 = sand.u32 1, %s2501_s30  }
  0x8b   : > { %p60_p12 = scmp.lt.s32.totalorder %s2513_s11, %s1720_s1  ;;  %s1721_s17 = sadd.s32 4294967295, %s2770_s6 }
  0x8c   : > { %p70_p13 = scmp.lt.s32.totalorder %s3551_s22, %s1721_s17  ;;  %p3485_p2 = scmp.eq.s32.totalorder %s2673_s14, 0 }
  0x8d   : > { %s61_s3 = scalar_select %p60_p12, %s2513_s11, %s1720_s1 }
  0x8e   : > { %p2834_p0 = por %p3485_p2, %p94_p6  ;;  %s1727_s28 = sshll.u32 %s3437_s18, 7 }
  0x8f   : > { %s71_s7 = scalar_select %p70_p13, %s3551_s22, %s1721_s17 }
  0x90   : > { %s3486_s19 = scalar_select %p2834_p0, 1, 0 }
  0x91   : > { %p62_p11 = scmp.gt.s32.totalorder %s61_s3, 0  ;;  %p72_p5 = scmp.gt.s32.totalorder %s71_s7, 0 }
  0x92   : > { %s266_s8 = scalar_lea.vmem [#allocation7], %s1727_s28  ;;  %p3487_p1 = scmp.lt.s32.totalorder %s2521_s13, 8 }
  0x93   : > { %s3563_s3 = smov (!%p62_p11, %s61_s3), 0  ;;  %s3565_s7 = smov (!%p72_p5, %s71_s7), 0 }
  0x94   : > { %s65_s6 = sadd.s32 %s2767_s15, %s3563_s3  ;;  %s75_s26 = sadd.s32 %s2773_s20, %s3565_s7 }
  0x95   : > { %p66_p7 = scmp.lt.s32.totalorder %s65_s6, 5  ;;  %p76_p8 = scmp.lt.s32.totalorder %s75_s26, 5 }
  0x96   : > { %s283_s1 = sshll.u32 %s266_s8, 4  ;;  %p2852_p4 = pnand %p3487_p1, %p2821_p3  ;;  %s2846_s1 = int_to_ptr.vmem [resolvable:$true] %s283_s1 }
  0x97   : > { %s3567_s6 = smov (!%p66_p7, %s65_s6), 5  ;;  %s3569_s26 = smov (!%p76_p8, %s75_s26), 5 }
  0x98   : > { %s1971_s17 = scalar_select %p2821_p3, [#allocation5], [#allocation17] }
  0x99   : > { %s78_s18 = ssub.s32 %s3567_s6, %s3569_s26  ;;  %s3489_s3 = sadd.s32 1, %s2501_s30 }
  0x9a   : > { %p79_p10 = scmp.eq.s32.totalorder %s78_s18, 0  ;;  %p3491_p6 = pmov %p3487_p1 }
  0x9b   : > { %s1972_s20 = scalar_select %p2821_p3, %s2517_s12, 0 }
  0x9c   : > { %s2862_s7 = scalar_select %p79_p10, %s2501_s30, %s3489_s3  }
  0x9d   : > { %s3571_s17 = smov (!%p3491_p6, %s1971_s17), [#allocation20]  ;;  %p3492_p12 = pmov %p3487_p1 }
  0x9e   : > { %3490 = sst [smem:[#allocation42_spill]] %s2862_s7  ;;  %p3493_p13 = pmov %p3487_p1 }
  0x9f   : > { %s3573_s20 = smov (!%p3492_p12, %s1972_s20), 0  ;;  %s1719_s26 = sadd.s32 4294967294, %s2521_s13  }
  0xa0   : > { %s1973_s18 = scalar_select %p2821_p3, [#allocation6], [#allocation18] }
  0xa1   : > { %s267_s28 = sld [smem:[%s3571_s17 + %s3573_s20]]  ;;  %s136_s3 = ssub.s32 %s2517_s12, %s3555_s0 }
  0xa2   : > { %s3575_s18 = smov (!%p3493_p13, %s1973_s18), [#allocation21]  ;;  %p137_p11 = scmp.eq.s32.totalorder %s136_s3, 0 }
  0xa3   : > { %s273_s6 = sld [smem:[%s3575_s18 + %s3573_s20]]  ;;  %s139_s4 = sadd.s32 1, %s2477_s24 }
  0xa4   : > { %p146_p5 = scmp.ne.s32.totalorder %s2477_s24, %s2473_s23  ;;  %p3495_p7 = scmp.eq.s32.totalorder %s2521_s13, 0 }
  0xa5   : > { %s2881_s9 = scalar_select %p137_p11, %s2477_s24, %s139_s4  }
  0xa6   : > { %p2885_p8 = por %p146_p5, %p3495_p7  ;;  %p152_p10 = scmp.ne.s32.totalorder %s2473_s23, %s2469_s2 }
  0xa7   : > { %s1728_s8 = sadd.s32 4294967295, %s267_s28  ;;  %3494 = sst [smem:[#allocation43_spill]] %s2881_s9 }
  0xa8   : > { %p269_p2 = scmp.lt.s32.totalorder %s2513_s11, %s1728_s8  ;;  %p3497_p1 = scmp.eq.s32.totalorder %s2673_s14, 7 }
  0xa9   : > { %p3500_p12 = scmp.eq.s32.totalorder %s2673_s14, 0  ;;  %s319_s28 = sand.u32 1, %s2477_s24  }
  0xaa   : > { %s270_s22 = scalar_select %p269_p2, %s2513_s11, %s1728_s8 }
  0xab   : > { %p2893_p6 = por %p3497_p1, %p146_p5  ;;  %p2899_p13 = por %p152_p10, %p3500_p12 }
  0xac   : > { %p271_p3 = scmp.gt.s32.totalorder %s270_s22, 0  ;;  %p229_p2 = scmp.eq.s32.totalorder %s1719_s26, 7 }
  0xad   : > { %s3498_s20 = scalar_select %p2893_p6, 1, 0 }
  0xae   : > { %s3577_s22 = smov (!%p271_p3, %s270_s22), 0  ;;  %p2904_p7 = por %p229_p2, %p152_p10 }
  0xaf   : > { %3499 = sst [smem:[#allocation44_spill]] %s3498_s20  ;;  %s274_s4 = sadd.s32 %s273_s6, %s3577_s22 }
  0xb0   : > { %s3501_s18 = scalar_select %p2899_p13, 1, 0 }
  0xb1   : > { %p275_p11 = scmp.lt.s32.totalorder %s274_s4, 5  ;;  %s2908_s3 = sshll.u32 %s319_s28, 8 }
  0xb2   : > { %s3502_s8 = scalar_select %p2904_p7, 1, 0 }
  0xb3   : > { %s1790_s0 = sshll.u32 %s2517_s12, 12  ;;  %s3579_s4 = smov (!%p275_p11, %s274_s4), 5 }
  0xb4   : > { %3503 = sst [smem:[#allocation45_spill]] %s3502_s8  ;;  %s2916_s25 = scalar_lea.hbm %s3417_s5, %s1790_s0 }
  0xb5   : > { %s1788_s22 = sshll.u32 %s3579_s4, 11  ;;  %s321_s6 = scalar_lea.vmem [#allocation12], %s2908_s3 }
  0xb6   : > { %s328_s26 = sshll.u32 %s321_s6, 4  ;;  %s3504_s24 = sld [smem:[#allocation46_spill]]  ;;  %s2924_s26 = int_to_ptr.vmem [resolvable:$true] %s328_s26 }
  0xb7   : > { %s3506_s28 = sand.u32 1, %s2501_s30   ;;  %p2269_p3 = pneg %p2852_p4 }
  0xb8   : > { %s2928_s8 = scalar_lea.sflag [#allocation8], %s3506_s28 }
  0xbc   : > { %s3505_s20 = smov %s3504_s24  ;;  %s2922_s2 = scalar_lea.hbm %s3504_s24, %s1788_s22 }
  0xbd   : > { %s2267_s11 = scalar_lea.hbm %s2922_s2, 2048  ;;  %s2272_s7 = scalar_lea.hbm %s3505_s20, 12288 }
  0xbe   : > { %p2268_p5 = scmp.ne.s32.totalorder %s2922_s2, %s2267_s11  ;;  %p2273_p12 = scmp.lt.u32.totalorder %s2922_s2, %s3505_s20 }
  0xbf   : > { %p2274_p2 = scmp.lt.u32.totalorder %s2272_s7, %s2267_s11  ;;  %p2276_p7 = scmp.lt.u32.totalorder %s2267_s11, %s2922_s2 }
  0xc0   : > { %p2270_p10 = pnand %p2269_p3, %p2268_p5 }
  0xc1   : > { %p2275_p11 = por %p2274_p2, %p2273_p12 }
  0xc2   : > { %p2271_p1 = pneg %p2270_p10 }
  0xc3   : > { %p2277_p6 = por %p2276_p7, %p2275_p11 }
  0xc5   : > { %p2278_p13 = pnand %p2277_p6, %p2271_p1 }
  0xc7   : > { %2281 = shalt.err (!%p2278_p13)
}
  0xc8   : > { %s2282_s22 = scalar_lea.vmem %s2846_s1, 2048  ;;  %s2530_s6 = smov [#allocation7]  }
  0xc9   : > { %p2283_p5 = scmp.ne.s32.totalorder %s2846_s1, %s2282_s22  ;;  %s2287_s28 = sshll.u32 %s2530_s6, 4  ;;  %s2288_s28 = int_to_ptr.vmem [resolvable:$false] %s2287_s28 }
  0xca   : > { %s2289_s27 = scalar_lea.vmem %s2288_s28, 4096  ;;  %p2290_p0 = scmp.lt.s32.totalorder %s2846_s1, %s2288_s28 }
  0xcb   : > { %p2285_p10 = pnand %p2283_p5, %p2269_p3  ;;  %p2291_p12 = scmp.lt.s32.totalorder %s2289_s27, %s2282_s22 }
  0xcd   : > { %p2286_p9 = pneg %p2285_p10  ;;  %p2292_p2 = por %p2291_p12, %p2290_p0 }
  0xcf   : > { %p2293_p7 = pnand %p2292_p2, %p2286_p9 }
  0xd1   : > { %2296 = shalt.err (!%p2293_p7)
}
  0xd2   : > { %2000 = dma.hbm_to_vmem [thread:$0]  (!%p2852_p4), %s2922_s2, 2048, %s2846_s1, %s2928_s8, %s3481_s10, %s3481_s10, %s3480_s21  }
  0xd3   : > { %p3507_p0 = scmp.lt.s32.totalorder %s2521_s13, 8  ;;  %s3509_s7 = sld [smem:[#allocation48_spill]] }
  0xd4   : > { %s2297_s4 = scalar_lea.hbm %s2916_s25, 4096  ;;  %s2302_s10 = scalar_lea.hbm %s3417_s5, 8192 }
  0xd5   : > { %p2963_p9 = pnand %p3507_p0, %p2885_p8  ;;  %p2298_p6 = scmp.ne.s32.totalorder %s2916_s25, %s2297_s4 }
  0xd6   : > { %p2303_p8 = scmp.lt.u32.totalorder %s2916_s25, %s3417_s5  ;;  %p2304_p1 = scmp.lt.u32.totalorder %s2302_s10, %s2297_s4 }
  0xd7   : > { %p2299_p13 = pneg %p2963_p9  ;;  %p2306_p5 = scmp.lt.u32.totalorder %s2297_s4, %s2916_s25 }
  0xd8   : > { %p2305_p11 = por %p2304_p1, %p2303_p8 }
  0xd9   : > { %s2972_s9 = scalar_lea.hbm %s3509_s7, %s1790_s0  ;;  %p2300_p4 = pnand %p2299_p13, %p2298_p6 }
  0xda   : > { %p2307_p10 = por %p2306_p5, %p2305_p11 }
  0xdb   : > { %p2301_p3 = pneg %p2300_p4 }
  0xdd   : > { %p2308_p12 = pnand %p2307_p10, %p2301_p3 }
  0xdf   : > { %2311 = shalt.err (!%p2308_p12)
}
  0xe0   : > { %s2312_s0 = scalar_lea.vmem %s2924_s26, 4096  ;;  %s2531_s8 = smov [#allocation12]  }
  0xe1   : > { %p2313_p2 = scmp.ne.s32.totalorder %s2924_s26, %s2312_s0  ;;  %s2317_s22 = sshll.u32 %s2531_s8, 4  ;;  %s2318_s22 = int_to_ptr.vmem [resolvable:$false] %s2317_s22 }
  0xe2   : > { %s2319_s6 = scalar_lea.vmem %s2318_s22, 8192  ;;  %p2320_p6 = scmp.lt.s32.totalorder %s2924_s26, %s2318_s22 }
  0xe3   : > { %p2315_p7 = pnand %p2313_p2, %p2299_p13  ;;  %p2321_p4 = scmp.lt.s32.totalorder %s2319_s6, %s2312_s0 }
  0xe5   : > { %p2316_p0 = pneg %p2315_p7  ;;  %p2322_p8 = por %p2321_p4, %p2320_p6 }
  0xe7   : > { %p2323_p1 = pnand %p2322_p8, %p2316_p0 }
  0xe9   : > { %2326 = shalt.err (!%p2323_p1)
}
  0xea   : > { %s2532_s28 = smov 128   ;;  %s2533_s27 = smov 8  }
  0xeb   : > { %2008 = dma.hbm_to_vmem [thread:$0]  (!%p2963_p9), %s2916_s25, 4096, %s2924_s26, %s2785_s16, %s2532_s28, %s2532_s28, %s2533_s27  }
  0xec   : > { %s342_s15 = scalar_lea.vmem [#allocation13], %s2908_s3  ;;  %s3510_s4 = sand.u32 1, %s2521_s13  }
  0xed   : > { %s349_s24 = sshll.u32 %s342_s15, 4  ;;  %s3008_s2 = scalar_lea.sflag [#allocation14], %s3510_s4  ;;  %s3004_s24 = int_to_ptr.vmem [resolvable:$true] %s349_s24 }
  0xee   : > { %s2327_s21 = scalar_lea.hbm %s2972_s9, 4096  ;;  %s2332_s17 = scalar_lea.hbm %s3509_s7, 8192 }
  0xef   : > { %p2328_p3 = scmp.ne.s32.totalorder %s2972_s9, %s2327_s21  ;;  %p2333_p10 = scmp.lt.u32.totalorder %s2972_s9, %s3509_s7 }
  0xf0   : > { %p2334_p12 = scmp.lt.u32.totalorder %s2332_s17, %s2327_s21  ;;  %p2336_p7 = scmp.lt.u32.totalorder %s2327_s21, %s2972_s9 }
  0xf1   : > { %p2330_p11 = pnand %p2328_p3, %p2299_p13 }
  0xf2   : > { %p2335_p2 = por %p2334_p12, %p2333_p10 }
  0xf3   : > { %p2331_p5 = pneg %p2330_p11 }
  0xf4   : > { %p2337_p0 = por %p2336_p7, %p2335_p2 }
  0xf6   : > { %p2338_p6 = pnand %p2337_p0, %p2331_p5 }
  0xf8   : > { %2341 = shalt.err (!%p2338_p6)
}
  0xf9   : > { %s2342_s25 = scalar_lea.vmem %s3004_s24, 4096  ;;  %s2534_s16 = smov [#allocation13]  }
  0xfa   : > { %p2343_p4 = scmp.ne.s32.totalorder %s3004_s24, %s2342_s25  ;;  %s2347_s3 = sshll.u32 %s2534_s16, 4  ;;  %s2348_s3 = int_to_ptr.vmem [resolvable:$false] %s2347_s3 }
  0xfb   : > { %s2349_s26 = scalar_lea.vmem %s2348_s3, 8192  ;;  %p2350_p3 = scmp.lt.s32.totalorder %s3004_s24, %s2348_s3 }
  0xfc   : > { %p2345_p8 = pnand %p2343_p4, %p2299_p13  ;;  %p2351_p11 = scmp.lt.s32.totalorder %s2349_s26, %s2342_s25 }
  0xfe   : > { %p2346_p1 = pneg %p2345_p8  ;;  %p2352_p10 = por %p2351_p11, %p2350_p3 }
 0x100   : > { %p2353_p12 = pnand %p2352_p10, %p2346_p1 }
 0x102   : > { %2356 = shalt.err (!%p2353_p12)
}
 0x103   : > { %2011 = dma.hbm_to_vmem [thread:$0]  (!%p2963_p9), %s2972_s9, 4096, %s3004_s24, %s3008_s2, %s2532_s28, %s2532_s28, %s2533_s27  }
 0x104   : > { %s3511_s22 = sld [smem:[#allocation37_spill]] }
 0x10a   : > { %p3512_p13 = scmp.ne.s32.totalorder %s3511_s22, 0 }
 0x10b   : > { %s363_s6 = sand.u32 (!%p3512_p13), 1, %s2497_s29   ;;  %p3513_p5 = scmp.ne.s32.totalorder (!%p3512_p13), %s3486_s19, 0 }
 0x10c   : > { %361 = sbr.rel (%p3512_p13) target bundleno = 922 (0x39a), region = 40  ;;  %s1742_s15 = sshll.u32 (!%p3512_p13), %s363_s6, 7 }
 0x10d   : > { %s364_s4 = scalar_lea.sflag (!%p3512_p13), [#allocation8], %s363_s6  ;;  %s3040_s21 = scalar_lea.vmem (!%p3512_p13), [#allocation7], %s1742_s15 }
 0x113   : > { %2444 = dma.done.wait (%p3513_p5), %s364_s4, 2048  }
 0x114   : > { %2446 = vsyncadd (%p3513_p5), %s364_s4, 4294965248  ;;  %s3514_s11 = sld [smem:[#allocation32_spill]]  ;;  %s3515_s10 = sld [smem:[#allocation40_spill]] }
 0x115   : > { %s372_s1 = sand.u32 1, %s2673_s14  }
 0x116   : > { %s373_s27 = scalar_lea.sflag [#allocation11], %s372_s1 }
 0x11a   : > { %s374_s9 = sand.u32 1, %s3514_s11   ;;  %p3516_p9 = scmp.ne.s32.totalorder %s3515_s10, 0 }
 0x11b   : > { %s1743_s28 = sshll.u32 %s374_s9, 6 }
 0x11c   : > { %s3048_s24 = scalar_lea.vmem [#allocation10], %s1743_s28 }
 0x11d   : > { %2448 = dma.done.wait (%p3516_p9), %s373_s27, 1024  }
 0x11e   : > { %2450 = vsyncadd (%p3516_p9), %s373_s27, 4294966272  ;;  %s383_s2 = sand.u32 1, %s2473_s23   ;;  %p3517_p2 = scmp.ne.s32.totalorder %s3501_s18, 0 }
 0x11f   : > { %s1744_s19 = sshll.u32 %s383_s2, 8 }
 0x120   : > { %s3057_s17 = scalar_lea.vmem [#allocation12], %s1744_s19 }
 0x121   : > { %2452 = dma.done.wait (%p3517_p2), %s373_s27, 4096  }
 0x122   : > { %2454 = vsyncadd (%p3517_p2), %s373_s27, 4294963200  ;;  %s391_s0 = scalar_lea.sflag [#allocation14], %s372_s1  ;;  %s3063_s8 = scalar_lea.vmem [#allocation13], %s1744_s19 }
 0x123   : > { %2456 = dma.done.wait (%p3517_p2), %s391_s0, 4096  }
 0x124   : > { %2458 = vsyncadd (%p3517_p2), %s391_s0, 4294963200  ;;  %p3518_p7 = scmp.eq.s32.totalorder %s2673_s14, 0 }
 0x126   : > { %2460 = dma.done.wait (%p3518_p7), [#allocation14], 1024   ;;  %p3519_p0 = pmov %p3518_p7 }
 0x127   : > { %s3073_s25 = scalar_lea.vmem [#allocation16], %s1744_s19  ;;  %s3520_s16 = sld [smem:[#allocation34_spill]] }
 0x128   : > { %2462 = vsyncadd (%p3519_p0), [#allocation14], 4294966272 }
 0x12d   : > { %p1748_p6 = scmp.ne.s32.totalorder %s3520_s16, 0 }
 0x12e   : > { %v2535_v0 = vmov (!%p1748_p6), 0.0  }
 0x12f   : > { %461 = sbr.rel (%p1748_p6) target bundleno = 319 (0x13f), region = 64  ;;  %462 = vst [vmem:[#allocation2] sm:$0xff] (!%p1748_p6), %v2535_v0  ;;  %463 = vst [vmem:[#allocation2 + $0x8] sm:$0xff] (!%p1748_p6), %v2535_v0 }
 0x130   : > { %464 = vst [vmem:[#allocation2 + $0x10] sm:$0xff] (!%p1748_p6), %v2535_v0  ;;  %465 = vst [vmem:[#allocation2 + $0x18] sm:$0xff] (!%p1748_p6), %v2535_v0 }
 0x131   : > { %466 = vst [vmem:[#allocation2 + $0x20] sm:$0xff] (!%p1748_p6), %v2535_v0  ;;  %467 = vst [vmem:[#allocation2 + $0x28] sm:$0xff] (!%p1748_p6), %v2535_v0 }
 0x132   : > { %468 = vst [vmem:[#allocation2 + $0x30] sm:$0xff] (!%p1748_p6), %v2535_v0  ;;  %469 = vst [vmem:[#allocation2 + $0x38] sm:$0xff] (!%p1748_p6), %v2535_v0 }
 0x133   : > { %470 = vst [vmem:[#allocation2 + $0x40] sm:$0xff] (!%p1748_p6), %v2535_v0  ;;  %471 = vst [vmem:[#allocation2 + $0x48] sm:$0xff] (!%p1748_p6), %v2535_v0 }
 0x134   : > { %472 = vst [vmem:[#allocation2 + $0x50] sm:$0xff] (!%p1748_p6), %v2535_v0  ;;  %473 = vst [vmem:[#allocation2 + $0x58] sm:$0xff] (!%p1748_p6), %v2535_v0 }
 0x135   : > { %474 = vst [vmem:[#allocation2 + $0x60] sm:$0xff] (!%p1748_p6), %v2535_v0  ;;  %475 = vst [vmem:[#allocation2 + $0x68] sm:$0xff] (!%p1748_p6), %v2535_v0 }
 0x136   : > { %476 = vst [vmem:[#allocation2 + $0x70] sm:$0xff] %v2535_v0  ;;  %477 = vst [vmem:[#allocation2 + $0x78] sm:$0xff] %v2535_v0 }
 0x137   : > { %478 = vst [vmem:[#allocation2 + $0x80] sm:$0xff] %v2535_v0  ;;  %479 = vst [vmem:[#allocation2 + $0x88] sm:$0xff] %v2535_v0 }
 0x138   : > { %480 = vst [vmem:[#allocation2 + $0x90] sm:$0xff] %v2535_v0  ;;  %481 = vst [vmem:[#allocation2 + $0x98] sm:$0xff] %v2535_v0 }
 0x139   : > { %482 = vst [vmem:[#allocation2 + $0xa0] sm:$0xff] %v2535_v0  ;;  %483 = vst [vmem:[#allocation2 + $0xa8] sm:$0xff] %v2535_v0 }
 0x13a   : > { %484 = vst [vmem:[#allocation2 + $0xb0] sm:$0xff] %v2535_v0  ;;  %485 = vst [vmem:[#allocation2 + $0xb8] sm:$0xff] %v2535_v0 }
 0x13b   : > { %486 = vst [vmem:[#allocation2 + $0xc0] sm:$0xff] %v2535_v0  ;;  %487 = vst [vmem:[#allocation2 + $0xc8] sm:$0xff] %v2535_v0 }
 0x13c   : > { %488 = vst [vmem:[#allocation2 + $0xd0] sm:$0xff] %v2535_v0  ;;  %489 = vst [vmem:[#allocation2 + $0xd8] sm:$0xff] %v2535_v0 }
 0x13d   : > { %490 = vst [vmem:[#allocation2 + $0xe0] sm:$0xff] %v2535_v0  ;;  %491 = vst [vmem:[#allocation2 + $0xe8] sm:$0xff] %v2535_v0 }
 0x13e   : > { %492 = vst [vmem:[#allocation2 + $0xf0] sm:$0xff] %v2535_v0  ;;  %493 = vst [vmem:[#allocation2 + $0xf8] sm:$0xff] %v2535_v0 }
 0x13f PF: > { %s3521_s14 = sld [smem:[#allocation35_spill]]  ;;  %s3522_s3 = sld [smem:[#allocation34_spill]] }
 0x145   : > { %s494_s18 = sld [smem:[#allocation5 + %s3521_s14]] }
 0x14b   : > { %p1749_p4 = scmp.ge.s32.totalorder %s3522_s3, %s494_s18 }
 0x14c   : > { %v2143_v1 = vld [vmem:[%s3048_s24] sm:$0xff] (!%p1749_p4)   ;;  %v2144_v2 = vld [vmem:[%s3048_s24 + $0x8] sm:$0xff] (!%p1749_p4)   ;;  %v2145_v3 = vld [vmem:[%s3048_s24 + $0x10] sm:$0xff] (!%p1749_p4)  }
 0x14d   : > { %498 = sbr.rel (%p1749_p4) target bundleno = 607 (0x25f), region = 68  ;;  %1841 = vmatprep.subr.bf16.mxu0 (!%p1749_p4), %v2143_v1  ;;  %1937 = vmatprep.subr.bf16.mxu1 (!%p1749_p4), %v2143_v1  ;;  %v2146_v4 = vld [vmem:[%s3048_s24 + $0x18] sm:$0xff] (!%p1749_p4)   ;;  %v2151_v5 = vld [vmem:[%s3040_s21] sm:$0xff] (!%p1749_p4)   ;;  %v2148_v8 = vld [vmem:[%s3048_s24 + $0x28] sm:$0xff] (!%p1749_p4)  }
 0x14e   : > { %1842 = vmatpush3.bf16.msra.mxu0 (!%p1749_p4), %v2143_v1  ;;  %1945 = vmatpush3.bf16.msra.mxu1 (!%p1749_p4), %v2143_v1  ;;  %v2152_v6 = vld [vmem:[%s3040_s21 + $0x40] sm:$0xff] (!%p1749_p4)   ;;  %v2149_v9 = vld [vmem:[%s3048_s24 + $0x30] sm:$0xff] (!%p1749_p4)   ;;  %v2150_v10 = vld [vmem:[%s3048_s24 + $0x38] sm:$0xff] (!%p1749_p4)  }
 0x14f   : > { %1843 = vmatprep.subr.bf16.mxu0 (!%p1749_p4), %v2144_v2  ;;  %1938 = vmatprep.subr.bf16.mxu1 (!%p1749_p4), %v2144_v2  ;;  %v2147_v7 = vld [vmem:[%s3048_s24 + $0x20] sm:$0xff] (!%p1749_p4)   ;;  %v2153_v11 = vld [vmem:[%s3040_s21 + $0x8] sm:$0xff] (!%p1749_p4)   ;;  %v2155_v13 = vld [vmem:[%s3040_s21 + $0x10] sm:$0xff] (!%p1749_p4)  }
 0x150   : > { %1857 = vmatprep.mubr.bf16.mxu0 (!%p1749_p4), %v2151_v5  ;;  %1873 = vmatprep.mubr.bf16.mxu1 (!%p1749_p4), %v2152_v6  ;;  %v2154_v12 = vld [vmem:[%s3040_s21 + $0x48] sm:$0xff] (!%p1749_p4)   ;;  %v2156_v14 = vld [vmem:[%s3040_s21 + $0x50] sm:$0xff] (!%p1749_p4)   ;;  %v2157_v15 = vld [vmem:[%s3040_s21 + $0x18] sm:$0xff] (!%p1749_p4)  }
 0x151   : > { %v2158_v16 = vld [vmem:[%s3040_s21 + $0x58] sm:$0xff] (!%p1749_p4)   ;;  %v2159_v17 = vld [vmem:[%s3040_s21 + $0x20] sm:$0xff] (!%p1749_p4)   ;;  %v2161_v19 = vld [vmem:[%s3040_s21 + $0x28] sm:$0xff] (!%p1749_p4)  }
 0x152   : > { %1844 = vmatpush3.bf16.msra.mxu0 (!%p1749_p4), %v2144_v2  ;;  %1946 = vmatpush3.bf16.msra.mxu1 (!%p1749_p4), %v2144_v2  ;;  %v2160_v18 = vld [vmem:[%s3040_s21 + $0x60] sm:$0xff] (!%p1749_p4)   ;;  %v2162_v20 = vld [vmem:[%s3040_s21 + $0x68] sm:$0xff] (!%p1749_p4)   ;;  %v2163_v21 = vld [vmem:[%s3040_s21 + $0x30] sm:$0xff] (!%p1749_p4)  }
 0x153   : > { %1845 = vmatprep.subr.bf16.mxu0 (!%p1749_p4), %v2145_v3  ;;  %1939 = vmatprep.subr.bf16.mxu1 (!%p1749_p4), %v2145_v3  ;;  %v2164_v22 = vld [vmem:[%s3040_s21 + $0x70] sm:$0xff] (!%p1749_p4)   ;;  %v2165_v23 = vld [vmem:[%s3040_s21 + $0x38] sm:$0xff] (!%p1749_p4)   ;;  %v499_v27 = vld [vmem:[#allocation2] sm:$0xff] (!%p1749_p4) }
 0x154   : > { %v2166_v24 = vld [vmem:[%s3040_s21 + $0x78] sm:$0xff]   ;;  %v501_v25 = vld [vmem:[#allocation2 + $0x10] sm:$0xff]  ;;  %v515_v28 = vld [vmem:[#allocation2 + $0x80] sm:$0xff] }
 0x155   : > { %v517_v26 = vld [vmem:[#allocation2 + $0x90] sm:$0xff]  ;;  %v502_v31 = vld [vmem:[#allocation2 + $0x18] sm:$0xff]  ;;  %v500_v37 = vld [vmem:[#allocation2 + $0x8] sm:$0xff] }
 0x156   : > { %1846 = vmatpush3.bf16.msra.mxu0 %v2145_v3  ;;  %1947 = vmatpush3.bf16.msra.mxu1 %v2145_v3  ;;  %v518_v32 = vld [vmem:[#allocation2 + $0x98] sm:$0xff]  ;;  %v516_v38 = vld [vmem:[#allocation2 + $0x88] sm:$0xff]  ;;  %v505_v49 = vld [vmem:[#allocation2 + $0x30] sm:$0xff] }
 0x157   : > { %1847 = vmatprep.subr.bf16.mxu0 %v2146_v4  ;;  %1940 = vmatprep.subr.bf16.mxu1 %v2146_v4  ;;  %v521_v50 = vld [vmem:[#allocation2 + $0xb0] sm:$0xff]  ;;  %v503_v51 = vld [vmem:[#allocation2 + $0x20] sm:$0xff]  ;;  %v506_v55 = vld [vmem:[#allocation2 + $0x38] sm:$0xff] }
 0x158   : > { %v519_v52 = vld [vmem:[#allocation2 + $0xa0] sm:$0xff]  ;;  %v522_v56 = vld [vmem:[#allocation2 + $0xb8] sm:$0xff]  ;;  %v504_v61 = vld [vmem:[#allocation2 + $0x28] sm:$0xff] }
 0x159   : > { %v520_v62 = vld [vmem:[#allocation2 + $0xa8] sm:$0xff] }
 0x15a   : > { %1848 = vmatpush3.bf16.msra.mxu0 %v2146_v4  ;;  %1948 = vmatpush3.bf16.msra.mxu1 %v2146_v4 }
 0x15b   : > { %1849 = vmatprep.subr.bf16.mxu0 %v2147_v7  ;;  %1941 = vmatprep.subr.bf16.mxu1 %v2147_v7 }
 0x15e   : > { %1850 = vmatpush3.bf16.msra.mxu0 %v2147_v7  ;;  %1949 = vmatpush3.bf16.msra.mxu1 %v2147_v7 }
 0x15f   : > { %1851 = vmatprep.subr.bf16.mxu0 %v2148_v8  ;;  %1942 = vmatprep.subr.bf16.mxu1 %v2148_v8 }
 0x162   : > { %1852 = vmatpush3.bf16.msra.mxu0 %v2148_v8  ;;  %1950 = vmatpush3.bf16.msra.mxu1 %v2148_v8 }
 0x163   : > { %1853 = vmatprep.subr.bf16.mxu0 %v2149_v9  ;;  %1943 = vmatprep.subr.bf16.mxu1 %v2149_v9 }
 0x166   : > { %1854 = vmatpush3.bf16.msra.mxu0 %v2149_v9  ;;  %1951 = vmatpush3.bf16.msra.mxu1 %v2149_v9  ;;  %v509_v9 = vld [vmem:[#allocation2 + $0x50] sm:$0xff] }
 0x167   : > { %1855 = vmatprep.subr.bf16.mxu0 %v2150_v10  ;;  %1944 = vmatprep.subr.bf16.mxu1 %v2150_v10 }
 0x16a   : > { %1856 = vmatpush3.bf16.msra.mxu0 %v2150_v10  ;;  %1952 = vmatpush3.bf16.msra.mxu1 %v2150_v10  ;;  %v525_v10 = vld [vmem:[#allocation2 + $0xd0] sm:$0xff] }
 0x16d   : > { %1858 = vmatmul.mubr.bf16.vlgmr.msra.gmra.mrb[0].mxu0 %v2153_v11  ;;  %1874 = vmatmul.mubr.bf16.vlgmr.msra.gmra.mrb[0].mxu1 %v2154_v12  ;;  %v507_v11 = vld [vmem:[#allocation2 + $0x40] sm:$0xff] }
 0x16e   : > { %1861 = vmatprep.mubr.bf16.mxu0 %v2155_v13  ;;  %1877 = vmatprep.mubr.bf16.mxu1 %v2156_v14  ;;  %v523_v12 = vld [vmem:[#allocation2 + $0xc0] sm:$0xff] }
 0x175   : > { %1862 = vmatmul.mubr.bf16.gmra.mrb[4].mxu0 %v2157_v15  ;;  %1878 = vmatmul.mubr.bf16.gmra.mrb[4].mxu1 %v2158_v16  ;;  %v510_v15 = vld [vmem:[#allocation2 + $0x58] sm:$0xff] }
 0x176   : > { %1865 = vmatprep.mubr.bf16.mxu0 %v2159_v17  ;;  %1881 = vmatprep.mubr.bf16.mxu1 %v2160_v18  ;;  %v526_v16 = vld [vmem:[#allocation2 + $0xd8] sm:$0xff] }
 0x17d   : > { %1866 = vmatmul.mubr.bf16.gmra.mrb[8].mxu0 %v2161_v19  ;;  %1882 = vmatmul.mubr.bf16.gmra.mrb[8].mxu1 %v2162_v20 }
 0x17e   : > { %1869 = vmatprep.mubr.bf16.mxu0 %v2163_v21  ;;  %1885 = vmatprep.mubr.bf16.mxu1 %v2164_v22  ;;  %v508_v21 = vld [vmem:[#allocation2 + $0x48] sm:$0xff] }
 0x17f   : > { %v524_v22 = vld [vmem:[#allocation2 + $0xc8] sm:$0xff] }
 0x185   : > { %1870 = vmatmul.mubr.bf16.gmra.mrb[12].mxu0 %v2165_v23  ;;  %1886 = vmatmul.mubr.bf16.gmra.mrb[12].mxu1 %v2166_v24 }
 0x240   : > { %v1859_v29 = vpop.f32.mrb[0].mxu0  ;;  %v1875_v30 = vpop.f32.mrb[0].mxu1 }
 0x241   : > { %v886_v33 = vadd.f32 %v1859_v29, %v501_v25  ;;  %v902_v34 = vadd.f32 %v1875_v30, %v517_v26  ;;  %v757_v35 = vpop.f32.mrb[1].mxu0  ;;  %v821_v36 = vpop.f32.mrb[1].mxu1 }
 0x242   : > { %v884_v39 = vadd.f32 %v757_v35, %v499_v27  ;;  %v900_v40 = vadd.f32 %v821_v36, %v515_v28  ;;  %v1860_v41 = vpop.f32.mrb[2].mxu0  ;;  %v1876_v42 = vpop.f32.mrb[2].mxu1  ;;  %v511_v35 = vld [vmem:[#allocation2 + $0x60] sm:$0xff] }
 0x243   : > { %918 = vst [vmem:[#allocation2 + $0x10] sm:$0xff] %v886_v33  ;;  %934 = vst [vmem:[#allocation2 + $0x90] sm:$0xff] %v902_v34  ;;  %v887_v43 = vadd.f32 %v1860_v41, %v502_v31  ;;  %v903_v44 = vadd.f32 %v1876_v42, %v518_v32  ;;  %v760_v45 = vpop.f32.mrb[3].mxu0  ;;  %v824_v46 = vpop.f32.mrb[3].mxu1  ;;  %v513_v33 = vld [vmem:[#allocation2 + $0x70] sm:$0xff]  ;;  %v527_v36 = vld [vmem:[#allocation2 + $0xe0] sm:$0xff] }
 0x244   : > { %916 = vst [vmem:[#allocation2] sm:$0xff] %v884_v39  ;;  %932 = vst [vmem:[#allocation2 + $0x80] sm:$0xff] %v900_v40  ;;  %v885_v47 = vadd.f32 %v760_v45, %v500_v37  ;;  %v901_v48 = vadd.f32 %v824_v46, %v516_v38  ;;  %v529_v34 = vld [vmem:[#allocation2 + $0xf0] sm:$0xff]  ;;  %v514_v39 = vld [vmem:[#allocation2 + $0x78] sm:$0xff] }
 0x245   : > { %919 = vst [vmem:[#allocation2 + $0x18] sm:$0xff] %v887_v43  ;;  %935 = vst [vmem:[#allocation2 + $0x98] sm:$0xff] %v903_v44  ;;  %v530_v40 = vld [vmem:[#allocation2 + $0xf8] sm:$0xff]  ;;  %v512_v45 = vld [vmem:[#allocation2 + $0x68] sm:$0xff] }
 0x246   : > { %917 = vst [vmem:[#allocation2 + $0x8] sm:$0xff] %v885_v47  ;;  %933 = vst [vmem:[#allocation2 + $0x88] sm:$0xff] %v901_v48  ;;  %v528_v46 = vld [vmem:[#allocation2 + $0xe8] sm:$0xff] }
 0x248   : > { %v1863_v53 = vpop.f32.mrb[4].mxu0  ;;  %v1879_v54 = vpop.f32.mrb[4].mxu1 }
 0x249   : > { %v890_v57 = vadd.f32 %v1863_v53, %v505_v49  ;;  %v906_v58 = vadd.f32 %v1879_v54, %v521_v50  ;;  %v773_v59 = vpop.f32.mrb[5].mxu0  ;;  %v837_v60 = vpop.f32.mrb[5].mxu1 }
 0x24a   : > { %v888_v63 = vadd.f32 %v773_v59, %v503_v51  ;;  %v904_v0 = vadd.f32 %v837_v60, %v519_v52  ;;  %v1864_v1 = vpop.f32.mrb[6].mxu0  ;;  %v1880_v2 = vpop.f32.mrb[6].mxu1 }
 0x24b   : > { %922 = vst [vmem:[#allocation2 + $0x30] sm:$0xff] %v890_v57  ;;  %938 = vst [vmem:[#allocation2 + $0xb0] sm:$0xff] %v906_v58  ;;  %v891_v3 = vadd.f32 %v1864_v1, %v506_v55  ;;  %v907_v4 = vadd.f32 %v1880_v2, %v522_v56  ;;  %v776_v5 = vpop.f32.mrb[7].mxu0  ;;  %v840_v6 = vpop.f32.mrb[7].mxu1 }
 0x24c   : > { %920 = vst [vmem:[#allocation2 + $0x20] sm:$0xff] %v888_v63  ;;  %936 = vst [vmem:[#allocation2 + $0xa0] sm:$0xff] %v904_v0  ;;  %v889_v7 = vadd.f32 %v776_v5, %v504_v61  ;;  %v905_v8 = vadd.f32 %v840_v6, %v520_v62 }
 0x24d   : > { %923 = vst [vmem:[#allocation2 + $0x38] sm:$0xff] %v891_v3  ;;  %939 = vst [vmem:[#allocation2 + $0xb8] sm:$0xff] %v907_v4 }
 0x24e   : > { %921 = vst [vmem:[#allocation2 + $0x28] sm:$0xff] %v889_v7  ;;  %937 = vst [vmem:[#allocation2 + $0xa8] sm:$0xff] %v905_v8 }
 0x250   : > { %v1867_v13 = vpop.f32.mrb[8].mxu0  ;;  %v1883_v14 = vpop.f32.mrb[8].mxu1 }
 0x251   : > { %v894_v17 = vadd.f32 %v1867_v13, %v509_v9  ;;  %v910_v18 = vadd.f32 %v1883_v14, %v525_v10  ;;  %v789_v19 = vpop.f32.mrb[9].mxu0  ;;  %v853_v20 = vpop.f32.mrb[9].mxu1 }
 0x252   : > { %v892_v23 = vadd.f32 %v789_v19, %v507_v11  ;;  %v908_v24 = vadd.f32 %v853_v20, %v523_v12  ;;  %v1868_v25 = vpop.f32.mrb[10].mxu0  ;;  %v1884_v26 = vpop.f32.mrb[10].mxu1 }
 0x253   : > { %926 = vst [vmem:[#allocation2 + $0x50] sm:$0xff] %v894_v17  ;;  %942 = vst [vmem:[#allocation2 + $0xd0] sm:$0xff] %v910_v18  ;;  %v895_v27 = vadd.f32 %v1868_v25, %v510_v15  ;;  %v911_v28 = vadd.f32 %v1884_v26, %v526_v16  ;;  %v792_v29 = vpop.f32.mrb[11].mxu0  ;;  %v856_v30 = vpop.f32.mrb[11].mxu1 }
 0x254   : > { %924 = vst [vmem:[#allocation2 + $0x40] sm:$0xff] %v892_v23  ;;  %940 = vst [vmem:[#allocation2 + $0xc0] sm:$0xff] %v908_v24  ;;  %v893_v31 = vadd.f32 %v792_v29, %v508_v21  ;;  %v909_v32 = vadd.f32 %v856_v30, %v524_v22 }
 0x255   : > { %927 = vst [vmem:[#allocation2 + $0x58] sm:$0xff] %v895_v27  ;;  %943 = vst [vmem:[#allocation2 + $0xd8] sm:$0xff] %v911_v28 }
 0x256   : > { %925 = vst [vmem:[#allocation2 + $0x48] sm:$0xff] %v893_v31  ;;  %941 = vst [vmem:[#allocation2 + $0xc8] sm:$0xff] %v909_v32 }
 0x258   : > { %v1871_v37 = vpop.f32.mrb[12].mxu0  ;;  %v1887_v38 = vpop.f32.mrb[12].mxu1 }
 0x259   : > { %v898_v41 = vadd.f32 %v1871_v37, %v513_v33  ;;  %v914_v42 = vadd.f32 %v1887_v38, %v529_v34  ;;  %v805_v43 = vpop.f32.mrb[13].mxu0  ;;  %v869_v44 = vpop.f32.mrb[13].mxu1 }
 0x25a   : > { %v896_v47 = vadd.f32 %v805_v43, %v511_v35  ;;  %v912_v48 = vadd.f32 %v869_v44, %v527_v36  ;;  %v1872_v49 = vpop.f32.mrb[14].mxu0  ;;  %v1888_v50 = vpop.f32.mrb[14].mxu1 }
 0x25b   : > { %930 = vst [vmem:[#allocation2 + $0x70] sm:$0xff] %v898_v41  ;;  %946 = vst [vmem:[#allocation2 + $0xf0] sm:$0xff] %v914_v42  ;;  %v899_v51 = vadd.f32 %v1872_v49, %v514_v39  ;;  %v915_v52 = vadd.f32 %v1888_v50, %v530_v40  ;;  %v808_v53 = vpop.f32.mrb[15].mxu0  ;;  %v872_v54 = vpop.f32.mrb[15].mxu1 }
 0x25c   : > { %928 = vst [vmem:[#allocation2 + $0x60] sm:$0xff] %v896_v47  ;;  %944 = vst [vmem:[#allocation2 + $0xe0] sm:$0xff] %v912_v48  ;;  %v897_v55 = vadd.f32 %v808_v53, %v512_v45  ;;  %v913_v56 = vadd.f32 %v872_v54, %v528_v46 }
 0x25d   : > { %931 = vst [vmem:[#allocation2 + $0x78] sm:$0xff] %v899_v51  ;;  %947 = vst [vmem:[#allocation2 + $0xf8] sm:$0xff] %v915_v52 }
 0x25e   : > { %929 = vst [vmem:[#allocation2 + $0x68] sm:$0xff] %v897_v55  ;;  %945 = vst [vmem:[#allocation2 + $0xe8] sm:$0xff] %v913_v56 }
 0x25f PF: > { %s3523_s26 = sld [smem:[#allocation34_spill]] }
 0x265   : > { %p1774_p8 = scmp.ne.s32.totalorder %s3523_s26, 3 }
 0x266   : > { %v2167_v57 = vld [vmem:[#allocation15] sm:$0xff] (!%p1774_p8)   ;;  %v2168_v58 = vld [vmem:[#allocation15 + $0x8] sm:$0xff] (!%p1774_p8)   ;;  %v2169_v59 = vld [vmem:[#allocation15 + $0x10] sm:$0xff] (!%p1774_p8)  }
 0x267   : > { %951 = sbr.rel (%p1774_p8) target bundleno = 894 (0x37e), region = 72  ;;  %1889 = vmatprep.subr.bf16.mxu0 (!%p1774_p8), %v2167_v57  ;;  %1953 = vmatprep.subr.bf16.mxu1 (!%p1774_p8), %v2167_v57  ;;  %v2170_v60 = vld [vmem:[#allocation15 + $0x18] sm:$0xff] (!%p1774_p8)   ;;  %v952_v61 = vld [vmem:[#allocation2] sm:$0xff] (!%p1774_p8)  ;;  %v953_v62 = vld [vmem:[#allocation2 + $0x8] sm:$0xff] (!%p1774_p8) }
 0x268   : > { %1890 = vmatpush3.bf16.msra.mxu0 (!%p1774_p8), %v2167_v57  ;;  %1961 = vmatpush3.bf16.msra.mxu1 (!%p1774_p8), %v2167_v57  ;;  %v1016_v63 = vld [vmem:[%s3057_s17] sm:$0xff] (!%p1774_p8)  ;;  %v984_v0 = vmul.f32 (!%p1774_p8), 0.9, %v952_v61  ;;  %v985_v1 = vmul.f32 (!%p1774_p8), 0.9, %v953_v62  ;;  %v1017_v2 = vld [vmem:[%s3057_s17 + $0x8] sm:$0xff] (!%p1774_p8) }
 0x269   : > { %1891 = vmatprep.subr.bf16.mxu0 (!%p1774_p8), %v2168_v58  ;;  %1954 = vmatprep.subr.bf16.mxu1 (!%p1774_p8), %v2168_v58  ;;  %v968_v3 = vld [vmem:[#allocation2 + $0x80] sm:$0xff] (!%p1774_p8)  ;;  %v1048_v4 = vmul.f32 (!%p1774_p8), 0.1, %v1016_v63  ;;  %v1049_v5 = vmul.f32 (!%p1774_p8), 0.1, %v1017_v2  ;;  %v969_v6 = vld [vmem:[#allocation2 + $0x88] sm:$0xff] (!%p1774_p8) }
 0x26a   : > { %v1032_v7 = vld [vmem:[%s3057_s17 + $0x80] sm:$0xff] (!%p1774_p8)  ;;  %v1000_v8 = vmul.f32 (!%p1774_p8), 0.9, %v968_v3  ;;  %v1001_v9 = vmul.f32 (!%p1774_p8), 0.9, %v969_v6  ;;  %v1033_v10 = vld [vmem:[%s3057_s17 + $0x88] sm:$0xff] (!%p1774_p8) }
 0x26b   : > { %v2171_v11 = vld [vmem:[#allocation15 + $0x20] sm:$0xff] (!%p1774_p8)   ;;  %v3107_v12 = vadd.f32 (!%p1774_p8), %v1048_v4, %v984_v0  ;;  %v3109_v13 = vadd.f32 (!%p1774_p8), %v1049_v5, %v985_v1  ;;  %v1064_v14 = vmul.f32 (!%p1774_p8), 0.1, %v1032_v7  ;;  %v1065_v15 = vmul.f32 (!%p1774_p8), 0.1, %v1033_v10  ;;  %v954_v16 = vld [vmem:[#allocation2 + $0x10] sm:$0xff] (!%p1774_p8) }
 0x26c   : > { %1892 = vmatpush3.bf16.msra.mxu0 (!%p1774_p8), %v2168_v58  ;;  %1962 = vmatpush3.bf16.msra.mxu1 (!%p1774_p8), %v2168_v58  ;;  %v955_v17 = vld [vmem:[#allocation2 + $0x18] sm:$0xff] (!%p1774_p8)  ;;  %v1018_v18 = vld [vmem:[%s3057_s17 + $0x10] sm:$0xff] (!%p1774_p8)  ;;  %v2172_v23 = vld [vmem:[#allocation15 + $0x28] sm:$0xff] (!%p1774_p8)   ;;  %v986_v25 = vmul.f32 (!%p1774_p8), 0.9, %v954_v16 }
 0x26d   : > { %1893 = vmatprep.subr.bf16.mxu0 (!%p1774_p8), %v2169_v59  ;;  %1955 = vmatprep.subr.bf16.mxu1 (!%p1774_p8), %v2169_v59  ;;  %v1112_v19 = vpack.c.bf16 (!%p1774_p8), %v3109_v13, %v3107_v12  ;;  %v3114_v20 = vadd.f32 (!%p1774_p8), %v1064_v14, %v1000_v8  ;;  %v1019_v21 = vld [vmem:[%s3057_s17 + $0x18] sm:$0xff] (!%p1774_p8)  ;;  %v970_v22 = vld [vmem:[#allocation2 + $0x90] sm:$0xff] (!%p1774_p8)  ;;  %v3117_v24 = vadd.f32 (!%p1774_p8), %v1065_v15, %v1001_v9  ;;  %v987_v28 = vmul.f32 (!%p1774_p8), 0.9, %v955_v17  ;;  %v956_v31 = vld [vmem:[#allocation2 + $0x20] sm:$0xff] (!%p1774_p8) }
 0x26e   : > { %v971_v26 = vld [vmem:[#allocation2 + $0x98] sm:$0xff]  ;;  %v1034_v27 = vld [vmem:[%s3057_s17 + $0x90] sm:$0xff]  ;;  %v1050_v29 = vmul.f32 0.1, %v1018_v18  ;;  %v1051_v33 = vmul.f32 0.1, %v1019_v21 }
 0x26f   : > { %v1035_v30 = vld [vmem:[%s3057_s17 + $0x98] sm:$0xff]  ;;  %1905 = vmatprep.mubr.bf16.mxu0 %v1112_v19  ;;  %v1120_v32 = vpack.c.bf16 %v3117_v24, %v3114_v20  ;;  %v1002_v34 = vmul.f32 0.9, %v970_v22  ;;  %v957_v35 = vld [vmem:[#allocation2 + $0x28] sm:$0xff]  ;;  %v1020_v36 = vld [vmem:[%s3057_s17 + $0x20] sm:$0xff] }
 0x270   : > { %1894 = vmatpush3.bf16.msra.mxu0 %v2169_v59  ;;  %1963 = vmatpush3.bf16.msra.mxu1 %v2169_v59  ;;  %v2173_v37 = vld [vmem:[#allocation15 + $0x30] sm:$0xff]   ;;  %v1003_v38 = vmul.f32 0.9, %v971_v26  ;;  %v1066_v39 = vmul.f32 0.1, %v1034_v27  ;;  %v1021_v40 = vld [vmem:[%s3057_s17 + $0x28] sm:$0xff]  ;;  %v3130_v62 = vadd.f32 %v1050_v29, %v986_v25  ;;  %v3132_v2 = vadd.f32 %v1051_v33, %v987_v28 }
 0x271   : > { %1895 = vmatprep.subr.bf16.mxu0 %v2170_v60  ;;  %1956 = vmatprep.subr.bf16.mxu1 %v2170_v60  ;;  %v1067_v41 = vmul.f32 0.1, %v1035_v30  ;;  %v988_v42 = vmul.f32 0.9, %v956_v31  ;;  %v972_v43 = vld [vmem:[#allocation2 + $0xa0] sm:$0xff]  ;;  %v973_v44 = vld [vmem:[#allocation2 + $0xa8] sm:$0xff] }
 0x272   : > { %v989_v45 = vmul.f32 0.9, %v957_v35  ;;  %v1052_v46 = vmul.f32 0.1, %v1020_v36  ;;  %v1036_v47 = vld [vmem:[%s3057_s17 + $0xa0] sm:$0xff]  ;;  %v1037_v48 = vld [vmem:[%s3057_s17 + $0xa8] sm:$0xff]  ;;  %1921 = vmatprep.mubr.bf16.mxu1 %v1120_v32  ;;  %v3134_v3 = vadd.f32 %v1066_v39, %v1002_v34  ;;  %v1113_v32 = vpack.c.bf16 %v3132_v2, %v3130_v62 }
 0x273   : > { %v1053_v49 = vmul.f32 0.1, %v1021_v40  ;;  %v1004_v50 = vmul.f32 0.9, %v972_v43  ;;  %v958_v51 = vld [vmem:[#allocation2 + $0x30] sm:$0xff]  ;;  %v959_v52 = vld [vmem:[#allocation2 + $0x38] sm:$0xff]  ;;  %v3136_v4 = vadd.f32 %v1067_v41, %v1003_v38 }
 0x274   : > { %1896 = vmatpush3.bf16.msra.mxu0 %v2170_v60  ;;  %1964 = vmatpush3.bf16.msra.mxu1 %v2170_v60  ;;  %v2174_v53 = vld [vmem:[#allocation15 + $0x38] sm:$0xff]   ;;  %v1005_v54 = vmul.f32 0.9, %v973_v44  ;;  %v1068_v55 = vmul.f32 0.1, %v1036_v47  ;;  %v1022_v56 = vld [vmem:[%s3057_s17 + $0x30] sm:$0xff]  ;;  %v3139_v9 = vadd.f32 %v1052_v46, %v988_v42 }
 0x275   : > { %1897 = vmatprep.subr.bf16.mxu0 %v2171_v11  ;;  %1957 = vmatprep.subr.bf16.mxu1 %v2171_v11  ;;  %v1023_v57 = vld [vmem:[%s3057_s17 + $0x38] sm:$0xff]  ;;  %v1069_v58 = vmul.f32 0.1, %v1037_v48  ;;  %v974_v59 = vld [vmem:[#allocation2 + $0xb0] sm:$0xff]  ;;  %v990_v63 = vmul.f32 0.9, %v958_v51  ;;  %v3141_v15 = vadd.f32 %v1053_v49, %v989_v45  ;;  %v1121_v33 = vpack.c.bf16 %v3136_v4, %v3134_v3 }
 0x276   : > { %v975_v60 = vld [vmem:[#allocation2 + $0xb8] sm:$0xff]  ;;  %v1038_v61 = vld [vmem:[%s3057_s17 + $0xb0] sm:$0xff]  ;;  %v991_v0 = vmul.f32 0.9, %v959_v52  ;;  %v1054_v1 = vmul.f32 0.1, %v1022_v56  ;;  %v3143_v16 = vadd.f32 %v1068_v55, %v1004_v50 }
 0x277   : > { %v1055_v5 = vmul.f32 0.1, %v1023_v57  ;;  %v1039_v6 = vld [vmem:[%s3057_s17 + $0xb8] sm:$0xff]  ;;  %v960_v7 = vld [vmem:[#allocation2 + $0x40] sm:$0xff]  ;;  %v961_v8 = vld [vmem:[#allocation2 + $0x48] sm:$0xff]  ;;  %v3145_v17 = vadd.f32 %v1069_v58, %v1005_v54  ;;  %v1114_v38 = vpack.c.bf16 %v3141_v15, %v3139_v9 }
 0x278   : > { %1898 = vmatpush3.bf16.msra.mxu0 %v2171_v11  ;;  %1965 = vmatpush3.bf16.msra.mxu1 %v2171_v11  ;;  %v1006_v10 = vmul.f32 0.9, %v974_v59  ;;  %v1007_v11 = vmul.f32 0.9, %v975_v60  ;;  %v1070_v14 = vmul.f32 0.1, %v1038_v61  ;;  %v3161_v43 = vadd.f32 %v1054_v1, %v990_v63 }
 0x279   : > { %1899 = vmatprep.subr.bf16.mxu0 %v2172_v23  ;;  %1958 = vmatprep.subr.bf16.mxu1 %v2172_v23  ;;  %v1071_v18 = vmul.f32 0.1, %v1039_v6  ;;  %v1024_v19 = vld [vmem:[%s3057_s17 + $0x40] sm:$0xff]  ;;  %v1025_v21 = vld [vmem:[%s3057_s17 + $0x48] sm:$0xff]  ;;  %v993_v25 = vmul.f32 0.9, %v961_v8  ;;  %v1122_v39 = vpack.c.bf16 %v3145_v17, %v3143_v16  ;;  %v3163_v44 = vadd.f32 %v1055_v5, %v991_v0 }
 0x27a   : > { %v976_v22 = vld [vmem:[#allocation2 + $0xc0] sm:$0xff]  ;;  %v977_v26 = vld [vmem:[#allocation2 + $0xc8] sm:$0xff]  ;;  %v1056_v28 = vmul.f32 0.1, %v1024_v19  ;;  %v1057_v29 = vmul.f32 0.1, %v1025_v21  ;;  %v3165_v48 = vadd.f32 %v1070_v14, %v1006_v10 }
 0x27b   : > { %v1040_v27 = vld [vmem:[%s3057_s17 + $0xc0] sm:$0xff]  ;;  %v1041_v30 = vld [vmem:[%s3057_s17 + $0xc8] sm:$0xff]  ;;  %v962_v31 = vld [vmem:[#allocation2 + $0x50] sm:$0xff]  ;;  %v1008_v34 = vmul.f32 0.9, %v976_v22  ;;  %v3167_v49 = vadd.f32 %v1071_v18, %v1007_v11  ;;  %v1115_v11 = vpack.c.bf16 %v3163_v44, %v3161_v43 }
 0x27c   : > { %1900 = vmatpush3.bf16.msra.mxu0 %v2172_v23  ;;  %1966 = vmatpush3.bf16.msra.mxu1 %v2172_v23  ;;  %v992_v23 = vmul.f32 0.9, %v960_v7  ;;  %v1009_v35 = vmul.f32 0.9, %v977_v26  ;;  %v963_v36 = vld [vmem:[#allocation2 + $0x58] sm:$0xff]  ;;  %v978_v46 = vld [vmem:[#allocation2 + $0xd0] sm:$0xff]  ;;  %v3173_v55 = vadd.f32 %v1057_v29, %v993_v25 }
 0x27d   : > { %1901 = vmatprep.subr.bf16.mxu0 %v2173_v37  ;;  %1959 = vmatprep.subr.bf16.mxu1 %v2173_v37  ;;  %v1072_v40 = vmul.f32 0.1, %v1040_v27  ;;  %v1073_v41 = vmul.f32 0.1, %v1041_v30  ;;  %v1027_v42 = vld [vmem:[%s3057_s17 + $0x58] sm:$0xff]  ;;  %v1042_v52 = vld [vmem:[%s3057_s17 + $0xd0] sm:$0xff]  ;;  %v1123_v21 = vpack.c.bf16 %v3167_v49, %v3165_v48 }
 0x27e   : > { %v994_v45 = vmul.f32 0.9, %v962_v31  ;;  %v979_v47 = vld [vmem:[#allocation2 + $0xd8] sm:$0xff]  ;;  %v995_v50 = vmul.f32 0.9, %v963_v36  ;;  %v3171_v54 = vadd.f32 %v1056_v28, %v992_v23  ;;  %v964_v58 = vld [vmem:[#allocation2 + $0x60] sm:$0xff] }
 0x27f   : > { %v1059_v56 = vmul.f32 0.1, %v1027_v42  ;;  %v1010_v57 = vmul.f32 0.9, %v978_v46  ;;  %v965_v59 = vld [vmem:[#allocation2 + $0x68] sm:$0xff]  ;;  %v3175_v60 = vadd.f32 %v1072_v40, %v1008_v34  ;;  %v3177_v61 = vadd.f32 %v1073_v41, %v1009_v35  ;;  %v1028_v1 = vld [vmem:[%s3057_s17 + $0x60] sm:$0xff] }
 0x280   : > { %1902 = vmatpush3.bf16.msra.mxu0 %v2173_v37  ;;  %1967 = vmatpush3.bf16.msra.mxu1 %v2173_v37  ;;  %v1026_v37 = vld [vmem:[%s3057_s17 + $0x50] sm:$0xff]  ;;  %v1011_v63 = vmul.f32 0.9, %v979_v47  ;;  %v1074_v0 = vmul.f32 0.1, %v1042_v52  ;;  %v1029_v5 = vld [vmem:[%s3057_s17 + $0x68] sm:$0xff]  ;;  %v1116_v22 = vpack.c.bf16 %v3173_v55, %v3171_v54 }
 0x281   : > { %1903 = vmatprep.subr.bf16.mxu0 %v2174_v53  ;;  %1960 = vmatprep.subr.bf16.mxu1 %v2174_v53  ;;  %v1058_v51 = vmul.f32 0.1, %v1026_v37  ;;  %v980_v7 = vld [vmem:[#allocation2 + $0xe0] sm:$0xff]  ;;  %v981_v8 = vld [vmem:[#allocation2 + $0xe8] sm:$0xff]  ;;  %v996_v14 = vmul.f32 0.9, %v964_v58  ;;  %v1124_v27 = vpack.c.bf16 %v3177_v61, %v3175_v60 }
 0x282   : > { %v1044_v10 = vld [vmem:[%s3057_s17 + $0xe0] sm:$0xff]  ;;  %v997_v18 = vmul.f32 0.9, %v965_v59  ;;  %v1060_v19 = vmul.f32 0.1, %v1028_v1  ;;  %v1045_v26 = vld [vmem:[%s3057_s17 + $0xe8] sm:$0xff]  ;;  %v3195_v35 = vadd.f32 %v1074_v0, %v1010_v57 }
 0x283   : > { %v1061_v23 = vmul.f32 0.1, %v1029_v5  ;;  %v1012_v25 = vmul.f32 0.9, %v980_v7  ;;  %v1013_v28 = vmul.f32 0.9, %v981_v8  ;;  %v3191_v31 = vadd.f32 %v1058_v51, %v994_v45 }
 0x284   : > { %1904 = vmatpush3.bf16.msra.mxu0 %v2174_v53  ;;  %1968 = vmatpush3.bf16.msra.mxu1 %v2174_v53  ;;  %v1043_v53 = vld [vmem:[%s3057_s17 + $0xd8] sm:$0xff]  ;;  %v1076_v29 = vmul.f32 0.1, %v1044_v10  ;;  %v1077_v30 = vmul.f32 0.1, %v1045_v26  ;;  %v3199_v37 = vadd.f32 %v1060_v19, %v996_v14  ;;  %v982_v40 = vld [vmem:[#allocation2 + $0xf0] sm:$0xff] }
 0x285   : > { %v1075_v6 = vmul.f32 0.1, %v1043_v53  ;;  %v967_v34 = vld [vmem:[#allocation2 + $0x78] sm:$0xff]  ;;  %v3203_v41 = vadd.f32 %v1061_v23, %v997_v18  ;;  %v1046_v47 = vld [vmem:[%s3057_s17 + $0xf0] sm:$0xff]  ;;  %v1014_v58 = vmul.f32 0.9, %v982_v40 }
 0x286   : > { %v3205_v42 = vadd.f32 %v1076_v29, %v1012_v25  ;;  %v3207_v45 = vadd.f32 %v1077_v30, %v1013_v28  ;;  %v983_v46 = vld [vmem:[#allocation2 + $0xf8] sm:$0xff]  ;;  %v999_v52 = vmul.f32 0.9, %v967_v34  ;;  %v1078_v0 = vmul.f32 0.1, %v1046_v47  ;;  %v1451_v28 = vld [vmem:[%s3063_s8 + $0x10] sm:$0xff] }
 0x287   : > { %1906 = vmatmul.mubr.bf16.vlgmr.msra.gmra.mrb[0].mxu0 %v1113_v32  ;;  %1922 = vmatmul.mubr.bf16.vlgmr.msra.gmra.mrb[0].mxu1 %v1121_v33  ;;  %v3193_v32 = vadd.f32 %v1059_v56, %v995_v50  ;;  %v966_v33 = vld [vmem:[#allocation2 + $0x70] sm:$0xff]  ;;  %v3197_v36 = vadd.f32 %v1075_v6, %v1011_v63  ;;  %v1047_v50 = vld [vmem:[%s3057_s17 + $0xf8] sm:$0xff]  ;;  %v1015_v63 = vmul.f32 0.9, %v983_v46  ;;  %v1118_v5 = vpack.c.bf16 %v3203_v41, %v3199_v37 }
 0x288   : > { %1909 = vmatprep.mubr.bf16.mxu0 %v1114_v38  ;;  %1925 = vmatprep.mubr.bf16.mxu1 %v1122_v39  ;;  %v1030_v38 = vld [vmem:[%s3057_s17 + $0x70] sm:$0xff]  ;;  %v1031_v39 = vld [vmem:[%s3057_s17 + $0x78] sm:$0xff]  ;;  %v998_v51 = vmul.f32 0.9, %v966_v33  ;;  %v1079_v1 = vmul.f32 0.1, %v1047_v50  ;;  %v1126_v6 = vpack.c.bf16 %v3207_v45, %v3205_v42  ;;  %v3223_v10 = vadd.f32 %v1078_v0, %v1014_v58 }
 0x289   : > { %v1117_v53 = vpack.c.bf16 %v3193_v32, %v3191_v31  ;;  %v1062_v56 = vmul.f32 0.1, %v1030_v38  ;;  %v1063_v57 = vmul.f32 0.1, %v1031_v39  ;;  %v1125_v59 = vpack.c.bf16 %v3197_v36, %v3195_v35  ;;  %v1449_v50 = vld [vmem:[%s3063_s8] sm:$0xff] }
 0x28a   : > { %v1385_v19 = vmul.f32 0.5, %v3107_v12  ;;  %v1403_v23 = vmul.f32 0.5, %v3134_v3  ;;  %v1401_v25 = vmul.f32 0.5, %v3114_v20  ;;  %v1402_v26 = vmul.f32 0.5, %v3117_v24  ;;  %v1467_v12 = vld [vmem:[%s3063_s8 + $0x90] sm:$0xff] }
 0x28b   : > { %v3219_v7 = vadd.f32 %v1062_v56, %v998_v51  ;;  %v3221_v8 = vadd.f32 %v1063_v57, %v999_v52  ;;  %v1388_v30 = vmul.f32 0.5, %v3132_v2  ;;  %v1391_v40 = vmul.f32 0.5, %v3161_v43  ;;  %v1465_v51 = vld [vmem:[%s3063_s8 + $0x80] sm:$0xff] }
 0x28c   : > { %v1407_v46 = vmul.f32 0.5, %v3165_v48 }
 0x28d   : > { %v1119_v14 = vpack.c.bf16 %v3221_v8, %v3219_v7 }
 0x28f   : > { %1910 = vmatmul.mubr.bf16.gmra.mrb[4].mxu0 %v1115_v11  ;;  %1926 = vmatmul.mubr.bf16.gmra.mrb[4].mxu1 %v1123_v21  ;;  %v3225_v11 = vadd.f32 %v1079_v1, %v1015_v63  ;;  %v1386_v21 = vmul.f32 0.5, %v3109_v13  ;;  %v1468_v63 = vld [vmem:[%s3063_s8 + $0x98] sm:$0xff] }
 0x290   : > { %1913 = vmatprep.mubr.bf16.mxu0 %v1116_v22  ;;  %1929 = vmatprep.mubr.bf16.mxu1 %v1124_v27  ;;  %v1387_v22 = vmul.f32 0.5, %v3130_v62  ;;  %v1404_v62 = vmul.f32 0.5, %v3136_v4 }
 0x291   : > { %v1127_v18 = vpack.c.bf16 %v3225_v11, %v3223_v10 }
 0x297   : > { %1914 = vmatmul.mubr.bf16.gmra.mrb[8].mxu0 %v1117_v53  ;;  %1930 = vmatmul.mubr.bf16.gmra.mrb[8].mxu1 %v1125_v59  ;;  %v1452_v59 = vld [vmem:[%s3063_s8 + $0x18] sm:$0xff] }
 0x298   : > { %1917 = vmatprep.mubr.bf16.mxu0 %v1118_v5  ;;  %1933 = vmatprep.mubr.bf16.mxu1 %v1126_v6 }
 0x29f   : > { %1918 = vmatmul.mubr.bf16.gmra.mrb[12].mxu0 %v1119_v14  ;;  %1934 = vmatmul.mubr.bf16.gmra.mrb[12].mxu1 %v1127_v18  ;;  %v1450_v14 = vld [vmem:[%s3063_s8 + $0x8] sm:$0xff] }
 0x2a0   : > { %v1466_v18 = vld [vmem:[%s3063_s8 + $0x88] sm:$0xff] }
 0x35a   : > { %v1907_v27 = vpop.f32.mrb[0].mxu0  ;;  %v1923_v29 = vpop.f32.mrb[0].mxu1 }
 0x35b   : > { %v1355_v33 = vmul.f32 0.5, %v1907_v27  ;;  %v1371_v34 = vmul.f32 0.5, %v1923_v29  ;;  %v1226_v38 = vpop.f32.mrb[1].mxu0  ;;  %v1290_v13 = vpop.f32.mrb[1].mxu1 }
 0x35c   : > { %v1353_v39 = vmul.f32 0.5, %v1226_v38  ;;  %v1369_v3 = vmul.f32 0.5, %v1290_v13  ;;  %v1908_v20 = vpop.f32.mrb[2].mxu0  ;;  %v1924_v24 = vpop.f32.mrb[2].mxu1  ;;  %v1455_v38 = vld [vmem:[%s3063_s8 + $0x30] sm:$0xff]  ;;  %v1392_v13 = vmul.f32 0.5, %v3163_v44 }
 0x35d   : > { %v1419_v47 = vadd.f32 %v1387_v22, %v1355_v33  ;;  %v1435_v2 = vadd.f32 %v1403_v23, %v1371_v34  ;;  %v1356_v52 = vmul.f32 0.5, %v1908_v20  ;;  %v1372_v53 = vmul.f32 0.5, %v1924_v24  ;;  %v1229_v56 = vpop.f32.mrb[3].mxu0  ;;  %v1293_v4 = vpop.f32.mrb[3].mxu1 }
 0x35e   : > { %v1417_v57 = vadd.f32 %v1385_v19, %v1353_v39  ;;  %v1433_v58 = vadd.f32 %v1401_v25, %v1369_v3  ;;  %v1354_v0 = vmul.f32 0.5, %v1229_v56  ;;  %v1370_v43 = vmul.f32 0.5, %v1293_v4  ;;  %v1453_v56 = vld [vmem:[%s3063_s8 + $0x20] sm:$0xff] }
 0x35f   : > { %v1483_v1 = vadd.f32 %v1451_v28, %v1419_v47  ;;  %v1499_v48 = vadd.f32 %v1467_v12, %v1435_v2  ;;  %v1420_v5 = vadd.f32 %v1388_v30, %v1356_v52  ;;  %v1436_v6 = vadd.f32 %v1404_v62, %v1372_v53  ;;  %v1469_v4 = vld [vmem:[%s3063_s8 + $0xa0] sm:$0xff] }
 0x360   : > { %v1481_v22 = vadd.f32 %v1449_v50, %v1417_v57  ;;  %v1497_v23 = vadd.f32 %v1465_v51, %v1433_v58  ;;  %v1418_v19 = vadd.f32 %v1386_v21, %v1354_v0  ;;  %v1434_v27 = vadd.f32 %v1402_v26, %v1370_v43  ;;  %v1471_v26 = vld [vmem:[%s3063_s8 + $0xb0] sm:$0xff]  ;;  %v1456_v0 = vld [vmem:[%s3063_s8 + $0x38] sm:$0xff] }
 0x361   : > { %1515 = vst [vmem:[%s3073_s25 + $0x10] sm:$0xff] %v1483_v1  ;;  %1531 = vst [vmem:[%s3073_s25 + $0x90] sm:$0xff] %v1499_v48  ;;  %v1484_v25 = vadd.f32 %v1452_v59, %v1420_v5  ;;  %v1500_v29 = vadd.f32 %v1468_v63, %v1436_v6  ;;  %v1389_v28 = vmul.f32 0.5, %v3139_v9  ;;  %v1405_v33 = vmul.f32 0.5, %v3143_v16  ;;  %v1472_v43 = vld [vmem:[%s3063_s8 + $0xb8] sm:$0xff]  ;;  %v1454_v5 = vld [vmem:[%s3063_s8 + $0x28] sm:$0xff] }
 0x362   : > { %1513 = vst [vmem:[%s3073_s25] sm:$0xff] %v1481_v22  ;;  %1529 = vst [vmem:[%s3073_s25 + $0x80] sm:$0xff] %v1497_v23  ;;  %v1482_v30 = vadd.f32 %v1450_v14, %v1418_v19  ;;  %v1498_v34 = vadd.f32 %v1466_v18, %v1434_v27  ;;  %v1911_v12 = vpop.f32.mrb[4].mxu0  ;;  %v1927_v21 = vpop.f32.mrb[4].mxu1  ;;  %v1408_v62 = vmul.f32 0.5, %v3167_v49  ;;  %v1390_v20 = vmul.f32 0.5, %v3141_v15  ;;  %v1470_v6 = vld [vmem:[%s3063_s8 + $0xa8] sm:$0xff] }
 0x363   : > { %1516 = vst [vmem:[%s3073_s25 + $0x18] sm:$0xff] %v1484_v25  ;;  %1532 = vst [vmem:[%s3073_s25 + $0x98] sm:$0xff] %v1500_v29  ;;  %v1359_v39 = vmul.f32 0.5, %v1911_v12  ;;  %v1375_v9 = vmul.f32 0.5, %v1927_v21  ;;  %v1242_v16 = vpop.f32.mrb[5].mxu0  ;;  %v1306_v3 = vpop.f32.mrb[5].mxu1 }
 0x364   : > { %v1406_v24 = vmul.f32 0.5, %v3145_v17  ;;  %1514 = vst [vmem:[%s3073_s25 + $0x8] sm:$0xff] %v1482_v30  ;;  %1530 = vst [vmem:[%s3073_s25 + $0x88] sm:$0xff] %v1498_v34  ;;  %v1357_v47 = vmul.f32 0.5, %v1242_v16  ;;  %v1373_v2 = vmul.f32 0.5, %v1306_v3  ;;  %v1912_v44 = vpop.f32.mrb[6].mxu0 }
 0x365   : > { %v1928_v49 = vpop.f32.mrb[6].mxu1  ;;  %v1395_v50 = vmul.f32 0.5, %v3191_v31  ;;  %v1411_v51 = vmul.f32 0.5, %v3195_v35  ;;  %v1423_v52 = vadd.f32 %v1391_v40, %v1359_v39  ;;  %v1439_v53 = vadd.f32 %v1407_v46, %v1375_v9  ;;  %v1245_v57 = vpop.f32.mrb[7].mxu0  ;;  %v1459_v34 = vld [vmem:[%s3063_s8 + $0x50] sm:$0xff] }
 0x366   : > { %v1360_v15 = vmul.f32 0.5, %v1912_v44  ;;  %v1376_v17 = vmul.f32 0.5, %v1928_v49  ;;  %v1309_v58 = vpop.f32.mrb[7].mxu1  ;;  %v1421_v59 = vadd.f32 %v1389_v28, %v1357_v47  ;;  %v1437_v63 = vadd.f32 %v1405_v33, %v1373_v2  ;;  %v1457_v2 = vld [vmem:[%s3063_s8 + $0x40] sm:$0xff] }
 0x367   : > { %v1358_v1 = vmul.f32 0.5, %v1245_v57  ;;  %v1374_v31 = vmul.f32 0.5, %v1309_v58  ;;  %v1487_v48 = vadd.f32 %v1455_v38, %v1423_v52  ;;  %v1503_v35 = vadd.f32 %v1471_v26, %v1439_v53  ;;  %v1473_v44 = vld [vmem:[%s3063_s8 + $0xc0] sm:$0xff] }
 0x368   : > { %v1424_v40 = vadd.f32 %v1392_v13, %v1360_v15  ;;  %v1440_v46 = vadd.f32 %v1408_v62, %v1376_v17  ;;  %v1485_v14 = vadd.f32 %v1453_v56, %v1421_v59  ;;  %v1501_v18 = vadd.f32 %v1469_v4, %v1437_v63  ;;  %v1460_v15 = vld [vmem:[%s3063_s8 + $0x58] sm:$0xff]  ;;  %v1458_v59 = vld [vmem:[%s3063_s8 + $0x48] sm:$0xff] }
 0x369   : > { %v1422_v22 = vadd.f32 %v1390_v20, %v1358_v1  ;;  %v1438_v23 = vadd.f32 %v1406_v24, %v1374_v31  ;;  %1519 = vst [vmem:[%s3073_s25 + $0x30] sm:$0xff] %v1487_v48  ;;  %1535 = vst [vmem:[%s3073_s25 + $0xb0] sm:$0xff] %v1503_v35  ;;  %v1393_v25 = vmul.f32 0.5, %v3171_v54  ;;  %v1409_v29 = vmul.f32 0.5, %v3175_v60  ;;  %v1475_v60 = vld [vmem:[%s3063_s8 + $0xd0] sm:$0xff]  ;;  %v1476_v17 = vld [vmem:[%s3063_s8 + $0xd8] sm:$0xff] }
 0x36a   : > { %v1488_v19 = vadd.f32 %v1456_v0, %v1424_v40  ;;  %v1504_v27 = vadd.f32 %v1472_v43, %v1440_v46  ;;  %1517 = vst [vmem:[%s3073_s25 + $0x20] sm:$0xff] %v1485_v14  ;;  %1533 = vst [vmem:[%s3073_s25 + $0xa0] sm:$0xff] %v1501_v18  ;;  %v1915_v30 = vpop.f32.mrb[8].mxu0  ;;  %v1931_v12 = vpop.f32.mrb[8].mxu1  ;;  %v1396_v38 = vmul.f32 0.5, %v3193_v32  ;;  %v1412_v21 = vmul.f32 0.5, %v3197_v36 }
 0x36b   : > { %v1486_v28 = vadd.f32 %v1454_v5, %v1422_v22  ;;  %v1502_v33 = vadd.f32 %v1470_v6, %v1438_v23  ;;  %v1363_v26 = vmul.f32 0.5, %v1915_v30  ;;  %v1379_v54 = vmul.f32 0.5, %v1931_v12  ;;  %v1258_v13 = vpop.f32.mrb[9].mxu0  ;;  %v1322_v62 = vpop.f32.mrb[9].mxu1  ;;  %v1474_v63 = vld [vmem:[%s3063_s8 + $0xc8] sm:$0xff]  ;;  %v1463_v18 = vld [vmem:[%s3063_s8 + $0x70] sm:$0xff] }
 0x36c   : > { %1520 = vst [vmem:[%s3073_s25 + $0x38] sm:$0xff] %v1488_v19  ;;  %1536 = vst [vmem:[%s3073_s25 + $0xb8] sm:$0xff] %v1504_v27  ;;  %v1394_v39 = vmul.f32 0.5, %v3173_v55  ;;  %v1361_v9 = vmul.f32 0.5, %v1258_v13  ;;  %v1377_v16 = vmul.f32 0.5, %v1322_v62  ;;  %v1916_v32 = vpop.f32.mrb[10].mxu0 }
 0x36d   : > { %1518 = vst [vmem:[%s3073_s25 + $0x28] sm:$0xff] %v1486_v28  ;;  %1534 = vst [vmem:[%s3073_s25 + $0xa8] sm:$0xff] %v1502_v33  ;;  %v1932_v3 = vpop.f32.mrb[10].mxu1  ;;  %v1410_v36 = vmul.f32 0.5, %v3177_v61  ;;  %v1399_v20 = vmul.f32 0.5, %v3219_v7  ;;  %v1427_v24 = vadd.f32 %v1395_v50, %v1363_v26  ;;  %v1443_v47 = vadd.f32 %v1411_v51, %v1379_v54  ;;  %v1261_v52 = vpop.f32.mrb[11].mxu0 }
 0x36e   : > { %v1364_v49 = vmul.f32 0.5, %v1916_v32  ;;  %v1380_v55 = vmul.f32 0.5, %v1932_v3  ;;  %v1325_v53 = vpop.f32.mrb[11].mxu1  ;;  %v1425_v56 = vadd.f32 %v1393_v25, %v1361_v9  ;;  %v1441_v4 = vadd.f32 %v1409_v29, %v1377_v16  ;;  %v1461_v26 = vld [vmem:[%s3063_s8 + $0x60] sm:$0xff]  ;;  %v1464_v16 = vld [vmem:[%s3063_s8 + $0x78] sm:$0xff] }
 0x36f   : > { %v1362_v57 = vmul.f32 0.5, %v1261_v52  ;;  %v1378_v61 = vmul.f32 0.5, %v1325_v53  ;;  %v1491_v58 = vadd.f32 %v1459_v34, %v1427_v24  ;;  %v1507_v7 = vadd.f32 %v1475_v60, %v1443_v47  ;;  %v1477_v54 = vld [vmem:[%s3063_s8 + $0xe0] sm:$0xff]  ;;  %v1480_v32 = vld [vmem:[%s3063_s8 + $0xf8] sm:$0xff]  ;;  %v1462_v47 = vld [vmem:[%s3063_s8 + $0x68] sm:$0xff] }
 0x370   : > { %v1428_v50 = vadd.f32 %v1396_v38, %v1364_v49  ;;  %v1444_v51 = vadd.f32 %v1412_v21, %v1380_v55  ;;  %v1489_v0 = vadd.f32 %v1457_v2, %v1425_v56  ;;  %v1505_v43 = vadd.f32 %v1473_v44, %v1441_v4  ;;  %v1478_v2 = vld [vmem:[%s3063_s8 + $0xe8] sm:$0xff] }
 0x371   : > { %v1426_v1 = vadd.f32 %v1394_v39, %v1362_v57  ;;  %v1442_v31 = vadd.f32 %v1410_v36, %v1378_v61  ;;  %1523 = vst [vmem:[%s3073_s25 + $0x50] sm:$0xff] %v1491_v58  ;;  %1539 = vst [vmem:[%s3073_s25 + $0xd0] sm:$0xff] %v1507_v7  ;;  %v1415_v40 = vmul.f32 0.5, %v3223_v10  ;;  %v1397_v46 = vmul.f32 0.5, %v3199_v37  ;;  %v1479_v37 = vld [vmem:[%s3063_s8 + $0xf0] sm:$0xff] }
 0x372   : > { %v1492_v48 = vadd.f32 %v1460_v15, %v1428_v50  ;;  %v1508_v35 = vadd.f32 %v1476_v17, %v1444_v51  ;;  %1521 = vst [vmem:[%s3073_s25 + $0x40] sm:$0xff] %v1489_v0  ;;  %1537 = vst [vmem:[%s3073_s25 + $0xc0] sm:$0xff] %v1505_v43  ;;  %v1919_v14 = vpop.f32.mrb[12].mxu0  ;;  %v1935_v22 = vpop.f32.mrb[12].mxu1  ;;  %v1413_v23 = vmul.f32 0.5, %v3205_v42  ;;  %v1400_v19 = vmul.f32 0.5, %v3221_v8 }
 0x373   : > { %v1490_v5 = vadd.f32 %v1458_v59, %v1426_v1  ;;  %v1506_v6 = vadd.f32 %v1474_v63, %v1442_v31  ;;  %v1367_v27 = vmul.f32 0.5, %v1919_v14  ;;  %v1383_v10 = vmul.f32 0.5, %v1935_v22  ;;  %v1274_v25 = vpop.f32.mrb[13].mxu0  ;;  %v1338_v29 = vpop.f32.mrb[13].mxu1 }
 0x374   : > { %1524 = vst [vmem:[%s3073_s25 + $0x58] sm:$0xff] %v1492_v48  ;;  %1540 = vst [vmem:[%s3073_s25 + $0xd8] sm:$0xff] %v1508_v35  ;;  %v1416_v28 = vmul.f32 0.5, %v3225_v11  ;;  %v1365_v33 = vmul.f32 0.5, %v1274_v25  ;;  %v1381_v30 = vmul.f32 0.5, %v1338_v29  ;;  %v1920_v42 = vpop.f32.mrb[14].mxu0 }
 0x375   : > { %1522 = vst [vmem:[%s3073_s25 + $0x48] sm:$0xff] %v1490_v5  ;;  %1538 = vst [vmem:[%s3073_s25 + $0xc8] sm:$0xff] %v1506_v6  ;;  %v1936_v34 = vpop.f32.mrb[14].mxu1  ;;  %v1398_v8 = vmul.f32 0.5, %v3203_v41  ;;  %v1414_v12 = vmul.f32 0.5, %v3207_v45  ;;  %v1431_v38 = vadd.f32 %v1399_v20, %v1367_v27  ;;  %v1447_v21 = vadd.f32 %v1415_v40, %v1383_v10  ;;  %v1277_v13 = vpop.f32.mrb[15].mxu0 }
 0x376   : > { %v1368_v60 = vmul.f32 0.5, %v1920_v42  ;;  %v1384_v11 = vmul.f32 0.5, %v1936_v34  ;;  %v1341_v62 = vpop.f32.mrb[15].mxu1  ;;  %v1429_v39 = vadd.f32 %v1397_v46, %v1365_v33  ;;  %v1445_v9 = vadd.f32 %v1413_v23, %v1381_v30 }
 0x377   : > { %v1366_v3 = vmul.f32 0.5, %v1277_v13  ;;  %v1382_v41 = vmul.f32 0.5, %v1341_v62  ;;  %v1495_v45 = vadd.f32 %v1463_v18, %v1431_v38  ;;  %v1511_v36 = vadd.f32 %v1479_v37, %v1447_v21 }
 0x378   : > { %v1432_v20 = vadd.f32 %v1400_v19, %v1368_v60  ;;  %v1448_v24 = vadd.f32 %v1416_v28, %v1384_v11  ;;  %v1493_v44 = vadd.f32 %v1461_v26, %v1429_v39  ;;  %v1509_v49 = vadd.f32 %v1477_v54, %v1445_v9 }
 0x379   : > { %v1430_v55 = vadd.f32 %v1398_v8, %v1366_v3  ;;  %v1446_v52 = vadd.f32 %v1414_v12, %v1382_v41  ;;  %1527 = vst [vmem:[%s3073_s25 + $0x70] sm:$0xff] %v1495_v45  ;;  %1543 = vst [vmem:[%s3073_s25 + $0xf0] sm:$0xff] %v1511_v36 }
 0x37a   : > { %v1496_v53 = vadd.f32 %v1464_v16, %v1432_v20  ;;  %v1512_v56 = vadd.f32 %v1480_v32, %v1448_v24  ;;  %1525 = vst [vmem:[%s3073_s25 + $0x60] sm:$0xff] %v1493_v44  ;;  %1541 = vst [vmem:[%s3073_s25 + $0xe0] sm:$0xff] %v1509_v49 }
 0x37b   : > { %v1494_v4 = vadd.f32 %v1462_v47, %v1430_v55  ;;  %v1510_v15 = vadd.f32 %v1478_v2, %v1446_v52 }
 0x37c   : > { %1528 = vst [vmem:[%s3073_s25 + $0x78] sm:$0xff] %v1496_v53  ;;  %1544 = vst [vmem:[%s3073_s25 + $0xf8] sm:$0xff] %v1512_v56 }
 0x37d   : > { %1526 = vst [vmem:[%s3073_s25 + $0x68] sm:$0xff] %v1494_v4  ;;  %1542 = vst [vmem:[%s3073_s25 + $0xe8] sm:$0xff] %v1510_v15 }
 0x37e PF: > { %s3524_s22 = sld [smem:[#allocation35_spill]]  ;;  %s3525_s6 = sld [smem:[#allocation44_spill]] }
 0x37f   : > { %s3526_s11 = sld [smem:[#allocation50_spill]]  ;;  %s1559_s9 = sshll.u32 %s3073_s25, 4  ;;  %s3334_s9 = int_to_ptr.vmem [resolvable:$true] %s1559_s9 }
 0x380   : > { %s3338_s28 = scalar_lea.sflag [#allocation9], %s383_s2  ;;  %s2357_s27 = scalar_lea.vmem %s3334_s9, 4096 }
 0x381   : > { %p2358_p1 = scmp.ne.s32.totalorder %s3334_s9, %s2357_s27  ;;  %s2536_s24 = smov [#allocation16]  }
 0x382   : > { %s2361_s19 = sshll.u32 %s2536_s24, 4  ;;  %s2362_s19 = int_to_ptr.vmem [resolvable:$false] %s2361_s19 }
 0x383   : > { %s2363_s17 = scalar_lea.vmem %s2362_s19, 8192  ;;  %p2364_p12 = scmp.lt.s32.totalorder %s3334_s9, %s2362_s19 }
 0x384   : > { %s1792_s15 = sshll.u32 %s3524_s22, 12  ;;  %p3528_p3 = scmp.ne.s32.totalorder %s3525_s6, 0 }
 0x385   : > { %s3527_s1 = smov %s3526_s11  ;;  %s3331_s10 = scalar_lea.hbm %s3526_s11, %s1792_s15 }
 0x386   : > { %p2359_p11 = pnand %p2358_p1, %p3528_p3  ;;  %p2365_p13 = scmp.lt.s32.totalorder %s2363_s17, %s2357_s27 }
 0x388   : > { %p2360_p10 = pneg %p2359_p11  ;;  %p2366_p5 = por %p2365_p13, %p2364_p12 }
 0x38a   : > { %p2367_p9 = pnand %p2366_p5, %p2360_p10 }
 0x38c   : > { %2370 = shalt.err (!%p2367_p9)
}
 0x38d   : > { %s2371_s2 = scalar_lea.hbm %s3331_s10, 4096  ;;  %s2375_s25 = scalar_lea.hbm %s3527_s1, 8192 }
 0x38e   : > { %p2372_p2 = scmp.ne.s32.totalorder %s3331_s10, %s2371_s2  ;;  %p2376_p6 = scmp.lt.u32.totalorder %s3331_s10, %s3527_s1 }
 0x38f   : > { %p2377_p4 = scmp.lt.u32.totalorder %s2375_s25, %s2371_s2  ;;  %p2379_p1 = scmp.lt.u32.totalorder %s2371_s2, %s3331_s10 }
 0x390   : > { %p2373_p7 = pnand %p2372_p2, %p3528_p3 }
 0x391   : > { %p2378_p8 = por %p2377_p4, %p2376_p6 }
 0x392   : > { %p2374_p0 = pneg %p2373_p7 }
 0x393   : > { %p2380_p11 = por %p2379_p1, %p2378_p8 }
 0x395   : > { %p2381_p10 = pnand %p2380_p11, %p2374_p0 }
 0x397   : > { %2384 = shalt.err (!%p2381_p10)
}
 0x398   : > { %s2537_s18 = smov 128   ;;  %s2538_s3 = smov 8  }
 0x399   : > { %1987 = dma.vmem_to_hbm [thread:$0]  (%p3528_p3), %s3334_s9, 4096, %s3331_s10, %s3338_s28, %s2537_s18, %s2537_s18, %s2538_s3  }
 0x39a PF: > { %s3529_s26 = sld [smem:[#allocation30_spill]]  ;;  %s3530_s22 = sld [smem:[#allocation45_spill]] }
 0x39b   : > { %p2019_p12 = scmp.ge.s32.totalorder %s2521_s13, 2 }
 0x3a0   : > { %s1574_s15 = sand.u32 1, %s3529_s26   ;;  %p3531_p13 = scmp.ne.s32.totalorder %s3530_s22, 0 }
 0x3a1   : > { %s1575_s4 = scalar_lea.sflag [#allocation9], %s1574_s15 }
 0x3a2   : > { %p2013_p5 = pnand %p2019_p12, %p3531_p13 }
 0x3a4   : > { %2464 = dma.done.wait (!%p2013_p5), %s1575_s4, 4096  }
 0x3a5   : > { %2466 = vsyncadd (!%p2013_p5), %s1575_s4, 4294963200  ;;  %s42_s13 = sadd.s32 1, %s2521_s13   ;;  %s3533_s6 = sld [smem:[#allocation31_spill]] }
 0x3a6   : > { %p3367_p9 = scmp.ge.s32.totalorder %s42_s13, 10   ;;  %s3534_s24 = sld [smem:[#allocation43_spill]] }
 0x3a7   : > { %s3535_s25 = sld [smem:[#allocation32_spill]]  ;;  %s3536_s26 = sld [smem:[#allocation33_spill]] }
 0x3a8   : > { %s3537_s27 = sld [smem:[#allocation41_spill]]  ;;  %s3538_s11 = sld [smem:[#allocation42_spill]] }
 0x3a9   : > { %s3539_s9 = sld [smem:[#allocation36_spill]]  ;;  %s3540_s19 = sld [smem:[#allocation38_spill]] }
 0x3aa   : > { %s3541_s17 = sld [smem:[#allocation39_spill]]  ;;  %s3542_s2 = smov %s2473_s23 }
 0x3ab   : > { %s3543_s23 = smov %s3533_s6  ;;  %s3544_s28 = smov %s2497_s29 }
 0x3ac   : > { %s3545_s29 = smov %s2501_s30  ;;  %s3547_s10 = smov %s2517_s12 }
 0x3ad   :  { %41 = sbr.rel (!%p3367_p9) target bundleno = 48 (0x30), region = 138 }
 0x3ae   : > { %s3546_s30 = smov %s3538_s11 }
 0x3af   : > { %s3548_s11 = smov %s3540_s19 }
 0x3b0   : > { %s3549_s12 = smov %s3541_s17 }
 0x3b4   :  { %1580 = vsyncpa [#allocation8], 1 }
 0x3b5   :  { %1582 = vsyncpa [#allocation8 + $0x1], 1 }
 0x3b6   :  { %1583 = vsyncpa [#allocation11], 1 }
 0x3b7   :  { %1585 = vsyncpa [#allocation11 + $0x1], 1 }
 0x3b8   :  { %1586 = vsyncpa [#allocation14], 1 }
 0x3b9   :  { %1588 = vsyncpa [#allocation14 + $0x1], 1 }
 0x3ba   :  { %1589 = vsyncpa [#allocation9], 1 }
 0x3bb   :  { %1591 = vsyncpa [#allocation9 + $0x1], 1 }

</bundles_post_ra>
